<compile_context>
chip_gen: v7x
topology: tpu7x:2x2x1
jax: 0.10.0
libtpu: 0.0.40
codegen_flags: <defaults>
</compile_context>

<pallas_src>
import functools

import jax
import jax.numpy as jnp
from jax.experimental import pallas as pl
from jax.experimental.pallas import tpu as pltpu

C_IN = 3
C_OUT = 4
K = 3


def _conv_kernel(w_ref, b_ref, x_ref, o_ref, *, c_in, c_out, k, w, nb, hw, nbc):
    # w_ref : SMEM (c_out*c_in*k*k,)   flattened OIHW weights (f32)
    # b_ref : SMEM (c_out,)            bias (f32)
    # x_ref : VMEM (nb, c_in*hw)       nb images, channels flattened on the lane axis
    # o_ref : VMEM (nb, c_out*hw)      full-width accumulators (cropped in wrapper)
    #
    # Process the batch in sublane chunks so the 4 accumulators + plane + tap
    # stay register-resident (~12-24 vregs per chunk); one store per acc/chunk.
    for nb0 in range(0, nb, nbc):
        rows = pl.ds(nb0, nbc)
        accs = [
            jnp.full((nbc, hw), b_ref[co], dtype=jnp.float32) for co in range(c_out)
        ]
        for ci in range(c_in):
            # One lane-dense (hw-wide, 128-aligned) load per channel per chunk;
            # cast after the DMA (keeps HBM traffic minimal for bf16 inputs).
            plane = x_ref[rows, pl.ds(ci * hw, hw)].astype(jnp.float32)
            for kh in range(k):
                for kw in range(k):
                    off = kh * w + kw
                    if off == 0:
                        shifted = plane
                    else:
                        # Realize the (kh, kw) tap as a flat lane-roll (XLU) of
                        # the per-channel slice.  Wrapped lanes land only at
                        # flat positions >= hw - off, all of which lie in the
                        # (i >= ho or j >= wo) region the wrapper crops.
                        shifted = pltpu.roll(plane, hw - off, axis=1)
                    # The 9 rolled taps are shared across all c_out channels;
                    # each weight's SMEM-scalar splat is used once per chunk.
                    for co in range(c_out):
                        wv = w_ref[((co * c_in + ci) * k + kh) * k + kw]
                        accs[co] = accs[co] + shifted * wv
        for co in range(c_out):
            # Lane-dense (hw-wide, 128-aligned) unmasked store, once per chunk.
            o_ref[rows, pl.ds(co * hw, hw)] = accs[co]


def _choose_images_per_block(n, per_image_bytes):
    # Target ~1 MiB of input per grid step (fixed ~0.35 us/step overhead < 10%).
    target_bytes = 1 << 20
    nb = max(8, target_bytes // max(per_image_bytes, 1))
    # Only split into multiple steps when N is large enough to give >= 8 steps
    # (>= 4 per v7x TensorCore) without dropping below an ~0.5 MiB / 8-image
    # floor.  On single-TC v5e/v6e the grid is a serial loop, so fewer, larger
    # steps are strictly better; this keeps g == 1 for small/medium N.
    min_nb = max(8, (512 * 1024) // max(per_image_bytes, 1))
    if n >= 8 * min_nb:
        nb = min(nb, pl.cdiv(n, 8))
    nb = min(nb, n)
    # Round up to a multiple of 8: full sublane/vreg occupancy even for tiny N
    # (batch is padded in the wrapper and the padding is sliced off).
    nb = -(-nb // 8) * 8
    return max(8, nb)


def color_model_forward(x, weight, bias):
    """x: (N, 3, H, W); weight: (4, 3, 3, 3); bias: (4,). Returns (N, 4, H-2, W-2) f32."""
    n, c_in, h, w = x.shape
    c_out = weight.shape[0]
    k = weight.shape[2]
    ho, wo = h - k + 1, w - k + 1
    hw = h * w
    # Fast path assumes hw is a multiple of 128 (lane-dense, 128-aligned channel
    # slices).  Other sizes are still correct, just slower.

    nb = _choose_images_per_block(n, c_in * hw * x.dtype.itemsize)
    g = pl.cdiv(n, nb)
    n_pad = g * nb

    if n_pad != n:
        x = jnp.pad(x, ((0, n_pad - n), (0, 0), (0, 0), (0, 0)))

    # Transpose-free packing: pure reshape, channels flattened on the lane axis.
    x_packed = x.reshape(g, nb, c_in * hw)  # (g, nb, c_in*hw)

    w_flat = weight.reshape(-1).astype(jnp.float32)
    b = bias.astype(jnp.float32)

    # Sublane chunk for register-resident accumulation (8 or 16 rows).
    nbc = 16 if nb % 16 == 0 else 8

    kernel = functools.partial(
        _conv_kernel, c_in=c_in, c_out=c_out, k=k, w=w, nb=nb, hw=hw, nbc=nbc
    )

    out_packed = pl.pallas_call(
        kernel,
        out_shape=jax.ShapeDtypeStruct((g, nb, c_out * hw), jnp.float32),
        grid=(g,),
        in_specs=[
            pl.BlockSpec(memory_space=pltpu.MemorySpace.SMEM),  # flattened weights
            pl.BlockSpec(memory_space=pltpu.MemorySpace.SMEM),  # bias
            pl.BlockSpec((None, nb, c_in * hw), lambda gi: (gi, 0, 0)),
        ],
        out_specs=pl.BlockSpec((None, nb, c_out * hw), lambda gi: (gi, 0, 0)),
        compiler_params=pltpu.CompilerParams(
            dimension_semantics=("parallel",)
        ),
    )(w_flat, b, x_packed)

    # Transpose-free unpack: reshape, then crop the wrap-around garbage
    # columns/rows and any batch padding.
    out = out_packed.reshape(n_pad, c_out, h, w)
    return out[:n, :, :ho, :wo]


def _reference_conv(x, weight, bias):
    out = jax.lax.conv_general_dilated(
        x.astype(jnp.float32), weight.astype(jnp.float32),
        window_strides=(1, 1), padding="VALID",
        dimension_numbers=("NCHW", "OIHW", "NCHW"),
    )
    return out + bias[None, :, None, None]


if __name__ == "__main__":
    key = jax.random.PRNGKey(0)
    kx, kw_key, kb_key = jax.random.split(key, 3)

    # Deterministic synthetic parameters (shapes from Conv2d(3, 4, 3, 1)).
    N, H, W = 2, 16, 16
    x = jax.random.normal(kx, (N, C_IN, H, W), dtype=jnp.float32)
    fan_in = C_IN * K * K
    bound = 1.0 / (fan_in ** 0.5)
    weight = jax.random.uniform(kw_key, (C_OUT, C_IN, K, K), jnp.float32, -bound, bound)
    bias = jax.random.uniform(kb_key, (C_OUT,), jnp.float32, -bound, bound)

    out = jax.block_until_ready(color_model_forward(x, weight, bias))

    ref = _reference_conv(x, weight, bias)
    assert out.shape == (N, C_OUT, H - 2, W - 2), out.shape
    assert jnp.allclose(out, ref, rtol=1e-5, atol=1e-5), "mismatch vs reference conv"

    print("KERNEL_OK")
</pallas_src>

<mosaic_0001>
module attributes {stable_mosaic.version = 11 : i64} {
  func.func @_conv_kernel(%arg0: i32, %arg1: memref<108xf32, #tpu.memory_space<smem>>, %arg2: memref<4xf32, #tpu.memory_space<smem>>, %arg3: memref<1x8x768xf32, #tpu.memory_space<vmem>>, %arg4: memref<1x8x1024xf32, #tpu.memory_space<vmem>>) attributes {dimension_semantics = [#tpu.dimension_semantics<parallel>], iteration_bounds = array<i64: 1>, scalar_prefetch = 0 : i64, scratch_operands = 0 : i64, tpu.core_type = #tpu.core_type<tc>, window_params = [{transform_indices = @transform_0, window_bounds = array<i64: 108>}, {transform_indices = @transform_1, window_bounds = array<i64: 4>}, {transform_indices = @transform_2, window_bounds = array<i64: 1, 8, 768>}, {transform_indices = @transform_3, window_bounds = array<i64: 1, 8, 1024>}]} {
    %c0 = arith.constant 0 : index
    %0 = memref.load %arg2[%c0] : memref<4xf32, #tpu.memory_space<smem>>
    %1 = vector.broadcast %0 : f32 to vector<8x256xf32>
    %c1 = arith.constant 1 : index
    %2 = memref.load %arg2[%c1] : memref<4xf32, #tpu.memory_space<smem>>
    %3 = vector.broadcast %2 : f32 to vector<8x256xf32>
    %c2 = arith.constant 2 : index
    %4 = memref.load %arg2[%c2] : memref<4xf32, #tpu.memory_space<smem>>
    %5 = vector.broadcast %4 : f32 to vector<8x256xf32>
    %c3 = arith.constant 3 : index
    %6 = memref.load %arg2[%c3] : memref<4xf32, #tpu.memory_space<smem>>
    %7 = vector.broadcast %6 : f32 to vector<8x256xf32>
    %c0_0 = arith.constant 0 : index
    %c0_1 = arith.constant 0 : index
    %c0_2 = arith.constant 0 : index
    %8 = vector.load %arg3[%c0_0, %c0_1, %c0_2] : memref<1x8x768xf32, #tpu.memory_space<vmem>>, vector<1x8x256xf32>
    %9 = vector.shape_cast %8 : vector<1x8x256xf32> to vector<8x256xf32>
    %c0_3 = arith.constant 0 : index
    %10 = memref.load %arg1[%c0_3] : memref<108xf32, #tpu.memory_space<smem>>
    %11 = vector.broadcast %10 : f32 to vector<8x256xf32>
    %12 = arith.mulf %9, %11 : vector<8x256xf32>
    %13 = arith.addf %1, %12 : vector<8x256xf32>
    %c27 = arith.constant 27 : index
    %14 = memref.load %arg1[%c27] : memref<108xf32, #tpu.memory_space<smem>>
    %15 = vector.broadcast %14 : f32 to vector<8x256xf32>
    %16 = arith.mulf %9, %15 : vector<8x256xf32>
    %17 = arith.addf %3, %16 : vector<8x256xf32>
    %c54 = arith.constant 54 : index
    %18 = memref.load %arg1[%c54] : memref<108xf32, #tpu.memory_space<smem>>
    %19 = vector.broadcast %18 : f32 to vector<8x256xf32>
    %20 = arith.mulf %9, %19 : vector<8x256xf32>
    %21 = arith.addf %5, %20 : vector<8x256xf32>
    %c81 = arith.constant 81 : index
    %22 = memref.load %arg1[%c81] : memref<108xf32, #tpu.memory_space<smem>>
    %23 = vector.broadcast %22 : f32 to vector<8x256xf32>
    %24 = arith.mulf %9, %23 : vector<8x256xf32>
    %25 = arith.addf %7, %24 : vector<8x256xf32>
    %c255_i32 = arith.constant 255 : i32
    %26 = tpu.dynamic_rotate %9 by %c255_i32 dim 1 : vector<8x256xf32>, i32 -> vector<8x256xf32>
    %c1_4 = arith.constant 1 : index
    %27 = memref.load %arg1[%c1_4] : memref<108xf32, #tpu.memory_space<smem>>
    %28 = vector.broadcast %27 : f32 to vector<8x256xf32>
    %29 = arith.mulf %26, %28 : vector<8x256xf32>
    %30 = arith.addf %13, %29 : vector<8x256xf32>
    %c28 = arith.constant 28 : index
    %31 = memref.load %arg1[%c28] : memref<108xf32, #tpu.memory_space<smem>>
    %32 = vector.broadcast %31 : f32 to vector<8x256xf32>
    %33 = arith.mulf %26, %32 : vector<8x256xf32>
    %34 = arith.addf %17, %33 : vector<8x256xf32>
    %c55 = arith.constant 55 : index
    %35 = memref.load %arg1[%c55] : memref<108xf32, #tpu.memory_space<smem>>
    %36 = vector.broadcast %35 : f32 to vector<8x256xf32>
    %37 = arith.mulf %26, %36 : vector<8x256xf32>
    %38 = arith.addf %21, %37 : vector<8x256xf32>
    %c82 = arith.constant 82 : index
    %39 = memref.load %arg1[%c82] : memref<108xf32, #tpu.memory_space<smem>>
    %40 = vector.broadcast %39 : f32 to vector<8x256xf32>
    %41 = arith.mulf %26, %40 : vector<8x256xf32>
    %42 = arith.addf %25, %41 : vector<8x256xf32>
    %c254_i32 = arith.constant 254 : i32
    %43 = tpu.dynamic_rotate %9 by %c254_i32 dim 1 : vector<8x256xf32>, i32 -> vector<8x256xf32>
    %c2_5 = arith.constant 2 : index
    %44 = memref.load %arg1[%c2_5] : memref<108xf32, #tpu.memory_space<smem>>
    %45 = vector.broadcast %44 : f32 to vector<8x256xf32>
    %46 = arith.mulf %43, %45 : vector<8x256xf32>
    %47 = arith.addf %30, %46 : vector<8x256xf32>
    %c29 = arith.constant 29 : index
    %48 = memref.load %arg1[%c29] : memref<108xf32, #tpu.memory_space<smem>>
    %49 = vector.broadcast %48 : f32 to vector<8x256xf32>
    %50 = arith.mulf %43, %49 : vector<8x256xf32>
    %51 = arith.addf %34, %50 : vector<8x256xf32>
    %c56 = arith.constant 56 : index
    %52 = memref.load %arg1[%c56] : memref<108xf32, #tpu.memory_space<smem>>
    %53 = vector.broadcast %52 : f32 to vector<8x256xf32>
    %54 = arith.mulf %43, %53 : vector<8x256xf32>
    %55 = arith.addf %38, %54 : vector<8x256xf32>
    %c83 = arith.constant 83 : index
    %56 = memref.load %arg1[%c83] : memref<108xf32, #tpu.memory_space<smem>>
    %57 = vector.broadcast %56 : f32 to vector<8x256xf32>
    %58 = arith.mulf %43, %57 : vector<8x256xf32>
    %59 = arith.addf %42, %58 : vector<8x256xf32>
    %c240_i32 = arith.constant 240 : i32
    %60 = tpu.dynamic_rotate %9 by %c240_i32 dim 1 : vector<8x256xf32>, i32 -> vector<8x256xf32>
    %c3_6 = arith.constant 3 : index
    %61 = memref.load %arg1[%c3_6] : memref<108xf32, #tpu.memory_space<smem>>
    %62 = vector.broadcast %61 : f32 to vector<8x256xf32>
    %63 = arith.mulf %60, %62 : vector<8x256xf32>
    %64 = arith.addf %47, %63 : vector<8x256xf32>
    %c30 = arith.constant 30 : index
    %65 = memref.load %arg1[%c30] : memref<108xf32, #tpu.memory_space<smem>>
    %66 = vector.broadcast %65 : f32 to vector<8x256xf32>
    %67 = arith.mulf %60, %66 : vector<8x256xf32>
    %68 = arith.addf %51, %67 : vector<8x256xf32>
    %c57 = arith.constant 57 : index
    %69 = memref.load %arg1[%c57] : memref<108xf32, #tpu.memory_space<smem>>
    %70 = vector.broadcast %69 : f32 to vector<8x256xf32>
    %71 = arith.mulf %60, %70 : vector<8x256xf32>
    %72 = arith.addf %55, %71 : vector<8x256xf32>
    %c84 = arith.constant 84 : index
    %73 = memref.load %arg1[%c84] : memref<108xf32, #tpu.memory_space<smem>>
    %74 = vector.broadcast %73 : f32 to vector<8x256xf32>
    %75 = arith.mulf %60, %74 : vector<8x256xf32>
    %76 = arith.addf %59, %75 : vector<8x256xf32>
    %c239_i32 = arith.constant 239 : i32
    %77 = tpu.dynamic_rotate %9 by %c239_i32 dim 1 : vector<8x256xf32>, i32 -> vector<8x256xf32>
    %c4 = arith.constant 4 : index
    %78 = memref.load %arg1[%c4] : memref<108xf32, #tpu.memory_space<smem>>
    %79 = vector.broadcast %78 : f32 to vector<8x256xf32>
    %80 = arith.mulf %77, %79 : vector<8x256xf32>
    %81 = arith.addf %64, %80 : vector<8x256xf32>
    %c31 = arith.constant 31 : index
    %82 = memref.load %arg1[%c31] : memref<108xf32, #tpu.memory_space<smem>>
    %83 = vector.broadcast %82 : f32 to vector<8x256xf32>
    %84 = arith.mulf %77, %83 : vector<8x256xf32>
    %85 = arith.addf %68, %84 : vector<8x256xf32>
    %c58 = arith.constant 58 : index
    %86 = memref.load %arg1[%c58] : memref<108xf32, #tpu.memory_space<smem>>
    %87 = vector.broadcast %86 : f32 to vector<8x256xf32>
    %88 = arith.mulf %77, %87 : vector<8x256xf32>
    %89 = arith.addf %72, %88 : vector<8x256xf32>
    %c85 = arith.constant 85 : index
    %90 = memref.load %arg1[%c85] : memref<108xf32, #tpu.memory_space<smem>>
    %91 = vector.broadcast %90 : f32 to vector<8x256xf32>
    %92 = arith.mulf %77, %91 : vector<8x256xf32>
    %93 = arith.addf %76, %92 : vector<8x256xf32>
    %c238_i32 = arith.constant 238 : i32
    %94 = tpu.dynamic_rotate %9 by %c238_i32 dim 1 : vector<8x256xf32>, i32 -> vector<8x256xf32>
    %c5 = arith.constant 5 : index
    %95 = memref.load %arg1[%c5] : memref<108xf32, #tpu.memory_space<smem>>
    %96 = vector.broadcast %95 : f32 to vector<8x256xf32>
    %97 = arith.mulf %94, %96 : vector<8x256xf32>
    %98 = arith.addf %81, %97 : vector<8x256xf32>
    %c32 = arith.constant 32 : index
    %99 = memref.load %arg1[%c32] : memref<108xf32, #tpu.memory_space<smem>>
    %100 = vector.broadcast %99 : f32 to vector<8x256xf32>
    %101 = arith.mulf %94, %100 : vector<8x256xf32>
    %102 = arith.addf %85, %101 : vector<8x256xf32>
    %c59 = arith.constant 59 : index
    %103 = memref.load %arg1[%c59] : memref<108xf32, #tpu.memory_space<smem>>
    %104 = vector.broadcast %103 : f32 to vector<8x256xf32>
    %105 = arith.mulf %94, %104 : vector<8x256xf32>
    %106 = arith.addf %89, %105 : vector<8x256xf32>
    %c86 = arith.constant 86 : index
    %107 = memref.load %arg1[%c86] : memref<108xf32, #tpu.memory_space<smem>>
    %108 = vector.broadcast %107 : f32 to vector<8x256xf32>
    %109 = arith.mulf %94, %108 : vector<8x256xf32>
    %110 = arith.addf %93, %109 : vector<8x256xf32>
    %c224_i32 = arith.constant 224 : i32
    %111 = tpu.dynamic_rotate %9 by %c224_i32 dim 1 : vector<8x256xf32>, i32 -> vector<8x256xf32>
    %c6 = arith.constant 6 : index
    %112 = memref.load %arg1[%c6] : memref<108xf32, #tpu.memory_space<smem>>
    %113 = vector.broadcast %112 : f32 to vector<8x256xf32>
    %114 = arith.mulf %111, %113 : vector<8x256xf32>
    %115 = arith.addf %98, %114 : vector<8x256xf32>
    %c33 = arith.constant 33 : index
    %116 = memref.load %arg1[%c33] : memref<108xf32, #tpu.memory_space<smem>>
    %117 = vector.broadcast %116 : f32 to vector<8x256xf32>
    %118 = arith.mulf %111, %117 : vector<8x256xf32>
    %119 = arith.addf %102, %118 : vector<8x256xf32>
    %c60 = arith.constant 60 : index
    %120 = memref.load %arg1[%c60] : memref<108xf32, #tpu.memory_space<smem>>
    %121 = vector.broadcast %120 : f32 to vector<8x256xf32>
    %122 = arith.mulf %111, %121 : vector<8x256xf32>
    %123 = arith.addf %106, %122 : vector<8x256xf32>
    %c87 = arith.constant 87 : index
    %124 = memref.load %arg1[%c87] : memref<108xf32, #tpu.memory_space<smem>>
    %125 = vector.broadcast %124 : f32 to vector<8x256xf32>
    %126 = arith.mulf %111, %125 : vector<8x256xf32>
    %127 = arith.addf %110, %126 : vector<8x256xf32>
    %c223_i32 = arith.constant 223 : i32
    %128 = tpu.dynamic_rotate %9 by %c223_i32 dim 1 : vector<8x256xf32>, i32 -> vector<8x256xf32>
    %c7 = arith.constant 7 : index
    %129 = memref.load %arg1[%c7] : memref<108xf32, #tpu.memory_space<smem>>
    %130 = vector.broadcast %129 : f32 to vector<8x256xf32>
    %131 = arith.mulf %128, %130 : vector<8x256xf32>
    %132 = arith.addf %115, %131 : vector<8x256xf32>
    %c34 = arith.constant 34 : index
    %133 = memref.load %arg1[%c34] : memref<108xf32, #tpu.memory_space<smem>>
    %134 = vector.broadcast %133 : f32 to vector<8x256xf32>
    %135 = arith.mulf %128, %134 : vector<8x256xf32>
    %136 = arith.addf %119, %135 : vector<8x256xf32>
    %c61 = arith.constant 61 : index
    %137 = memref.load %arg1[%c61] : memref<108xf32, #tpu.memory_space<smem>>
    %138 = vector.broadcast %137 : f32 to vector<8x256xf32>
    %139 = arith.mulf %128, %138 : vector<8x256xf32>
    %140 = arith.addf %123, %139 : vector<8x256xf32>
    %c88 = arith.constant 88 : index
    %141 = memref.load %arg1[%c88] : memref<108xf32, #tpu.memory_space<smem>>
    %142 = vector.broadcast %141 : f32 to vector<8x256xf32>
    %143 = arith.mulf %128, %142 : vector<8x256xf32>
    %144 = arith.addf %127, %143 : vector<8x256xf32>
    %c222_i32 = arith.constant 222 : i32
    %145 = tpu.dynamic_rotate %9 by %c222_i32 dim 1 : vector<8x256xf32>, i32 -> vector<8x256xf32>
    %c8 = arith.constant 8 : index
    %146 = memref.load %arg1[%c8] : memref<108xf32, #tpu.memory_space<smem>>
    %147 = vector.broadcast %146 : f32 to vector<8x256xf32>
    %148 = arith.mulf %145, %147 : vector<8x256xf32>
    %149 = arith.addf %132, %148 : vector<8x256xf32>
    %c35 = arith.constant 35 : index
    %150 = memref.load %arg1[%c35] : memref<108xf32, #tpu.memory_space<smem>>
    %151 = vector.broadcast %150 : f32 to vector<8x256xf32>
    %152 = arith.mulf %145, %151 : vector<8x256xf32>
    %153 = arith.addf %136, %152 : vector<8x256xf32>
    %c62 = arith.constant 62 : index
    %154 = memref.load %arg1[%c62] : memref<108xf32, #tpu.memory_space<smem>>
    %155 = vector.broadcast %154 : f32 to vector<8x256xf32>
    %156 = arith.mulf %145, %155 : vector<8x256xf32>
    %157 = arith.addf %140, %156 : vector<8x256xf32>
    %c89 = arith.constant 89 : index
    %158 = memref.load %arg1[%c89] : memref<108xf32, #tpu.memory_space<smem>>
    %159 = vector.broadcast %158 : f32 to vector<8x256xf32>
    %160 = arith.mulf %145, %159 : vector<8x256xf32>
    %161 = arith.addf %144, %160 : vector<8x256xf32>
    %c0_7 = arith.constant 0 : index
    %c0_8 = arith.constant 0 : index
    %c256 = arith.constant 256 : index
    %162 = vector.load %arg3[%c0_7, %c0_8, %c256] : memref<1x8x768xf32, #tpu.memory_space<vmem>>, vector<1x8x256xf32>
    %163 = vector.shape_cast %162 : vector<1x8x256xf32> to vector<8x256xf32>
    %c9 = arith.constant 9 : index
    %164 = memref.load %arg1[%c9] : memref<108xf32, #tpu.memory_space<smem>>
    %165 = vector.broadcast %164 : f32 to vector<8x256xf32>
    %166 = arith.mulf %163, %165 : vector<8x256xf32>
    %167 = arith.addf %149, %166 : vector<8x256xf32>
    %c36 = arith.constant 36 : index
    %168 = memref.load %arg1[%c36] : memref<108xf32, #tpu.memory_space<smem>>
    %169 = vector.broadcast %168 : f32 to vector<8x256xf32>
    %170 = arith.mulf %163, %169 : vector<8x256xf32>
    %171 = arith.addf %153, %170 : vector<8x256xf32>
    %c63 = arith.constant 63 : index
    %172 = memref.load %arg1[%c63] : memref<108xf32, #tpu.memory_space<smem>>
    %173 = vector.broadcast %172 : f32 to vector<8x256xf32>
    %174 = arith.mulf %163, %173 : vector<8x256xf32>
    %175 = arith.addf %157, %174 : vector<8x256xf32>
    %c90 = arith.constant 90 : index
    %176 = memref.load %arg1[%c90] : memref<108xf32, #tpu.memory_space<smem>>
    %177 = vector.broadcast %176 : f32 to vector<8x256xf32>
    %178 = arith.mulf %163, %177 : vector<8x256xf32>
    %179 = arith.addf %161, %178 : vector<8x256xf32>
    %c255_i32_9 = arith.constant 255 : i32
    %180 = tpu.dynamic_rotate %163 by %c255_i32_9 dim 1 : vector<8x256xf32>, i32 -> vector<8x256xf32>
    %c10 = arith.constant 10 : index
    %181 = memref.load %arg1[%c10] : memref<108xf32, #tpu.memory_space<smem>>
    %182 = vector.broadcast %181 : f32 to vector<8x256xf32>
    %183 = arith.mulf %180, %182 : vector<8x256xf32>
    %184 = arith.addf %167, %183 : vector<8x256xf32>
    %c37 = arith.constant 37 : index
    %185 = memref.load %arg1[%c37] : memref<108xf32, #tpu.memory_space<smem>>
    %186 = vector.broadcast %185 : f32 to vector<8x256xf32>
    %187 = arith.mulf %180, %186 : vector<8x256xf32>
    %188 = arith.addf %171, %187 : vector<8x256xf32>
    %c64 = arith.constant 64 : index
    %189 = memref.load %arg1[%c64] : memref<108xf32, #tpu.memory_space<smem>>
    %190 = vector.broadcast %189 : f32 to vector<8x256xf32>
    %191 = arith.mulf %180, %190 : vector<8x256xf32>
    %192 = arith.addf %175, %191 : vector<8x256xf32>
    %c91 = arith.constant 91 : index
    %193 = memref.load %arg1[%c91] : memref<108xf32, #tpu.memory_space<smem>>
    %194 = vector.broadcast %193 : f32 to vector<8x256xf32>
    %195 = arith.mulf %180, %194 : vector<8x256xf32>
    %196 = arith.addf %179, %195 : vector<8x256xf32>
    %c254_i32_10 = arith.constant 254 : i32
    %197 = tpu.dynamic_rotate %163 by %c254_i32_10 dim 1 : vector<8x256xf32>, i32 -> vector<8x256xf32>
    %c11 = arith.constant 11 : index
    %198 = memref.load %arg1[%c11] : memref<108xf32, #tpu.memory_space<smem>>
    %199 = vector.broadcast %198 : f32 to vector<8x256xf32>
    %200 = arith.mulf %197, %199 : vector<8x256xf32>
    %201 = arith.addf %184, %200 : vector<8x256xf32>
    %c38 = arith.constant 38 : index
    %202 = memref.load %arg1[%c38] : memref<108xf32, #tpu.memory_space<smem>>
    %203 = vector.broadcast %202 : f32 to vector<8x256xf32>
    %204 = arith.mulf %197, %203 : vector<8x256xf32>
    %205 = arith.addf %188, %204 : vector<8x256xf32>
    %c65 = arith.constant 65 : index
    %206 = memref.load %arg1[%c65] : memref<108xf32, #tpu.memory_space<smem>>
    %207 = vector.broadcast %206 : f32 to vector<8x256xf32>
    %208 = arith.mulf %197, %207 : vector<8x256xf32>
    %209 = arith.addf %192, %208 : vector<8x256xf32>
    %c92 = arith.constant 92 : index
    %210 = memref.load %arg1[%c92] : memref<108xf32, #tpu.memory_space<smem>>
    %211 = vector.broadcast %210 : f32 to vector<8x256xf32>
    %212 = arith.mulf %197, %211 : vector<8x256xf32>
    %213 = arith.addf %196, %212 : vector<8x256xf32>
    %c240_i32_11 = arith.constant 240 : i32
    %214 = tpu.dynamic_rotate %163 by %c240_i32_11 dim 1 : vector<8x256xf32>, i32 -> vector<8x256xf32>
    %c12 = arith.constant 12 : index
    %215 = memref.load %arg1[%c12] : memref<108xf32, #tpu.memory_space<smem>>
    %216 = vector.broadcast %215 : f32 to vector<8x256xf32>
    %217 = arith.mulf %214, %216 : vector<8x256xf32>
    %218 = arith.addf %201, %217 : vector<8x256xf32>
    %c39 = arith.constant 39 : index
    %219 = memref.load %arg1[%c39] : memref<108xf32, #tpu.memory_space<smem>>
    %220 = vector.broadcast %219 : f32 to vector<8x256xf32>
    %221 = arith.mulf %214, %220 : vector<8x256xf32>
    %222 = arith.addf %205, %221 : vector<8x256xf32>
    %c66 = arith.constant 66 : index
    %223 = memref.load %arg1[%c66] : memref<108xf32, #tpu.memory_space<smem>>
    %224 = vector.broadcast %223 : f32 to vector<8x256xf32>
    %225 = arith.mulf %214, %224 : vector<8x256xf32>
    %226 = arith.addf %209, %225 : vector<8x256xf32>
    %c93 = arith.constant 93 : index
    %227 = memref.load %arg1[%c93] : memref<108xf32, #tpu.memory_space<smem>>
    %228 = vector.broadcast %227 : f32 to vector<8x256xf32>
    %229 = arith.mulf %214, %228 : vector<8x256xf32>
    %230 = arith.addf %213, %229 : vector<8x256xf32>
    %c239_i32_12 = arith.constant 239 : i32
    %231 = tpu.dynamic_rotate %163 by %c239_i32_12 dim 1 : vector<8x256xf32>, i32 -> vector<8x256xf32>
    %c13 = arith.constant 13 : index
    %232 = memref.load %arg1[%c13] : memref<108xf32, #tpu.memory_space<smem>>
    %233 = vector.broadcast %232 : f32 to vector<8x256xf32>
    %234 = arith.mulf %231, %233 : vector<8x256xf32>
    %235 = arith.addf %218, %234 : vector<8x256xf32>
    %c40 = arith.constant 40 : index
    %236 = memref.load %arg1[%c40] : memref<108xf32, #tpu.memory_space<smem>>
    %237 = vector.broadcast %236 : f32 to vector<8x256xf32>
    %238 = arith.mulf %231, %237 : vector<8x256xf32>
    %239 = arith.addf %222, %238 : vector<8x256xf32>
    %c67 = arith.constant 67 : index
    %240 = memref.load %arg1[%c67] : memref<108xf32, #tpu.memory_space<smem>>
    %241 = vector.broadcast %240 : f32 to vector<8x256xf32>
    %242 = arith.mulf %231, %241 : vector<8x256xf32>
    %243 = arith.addf %226, %242 : vector<8x256xf32>
    %c94 = arith.constant 94 : index
    %244 = memref.load %arg1[%c94] : memref<108xf32, #tpu.memory_space<smem>>
    %245 = vector.broadcast %244 : f32 to vector<8x256xf32>
    %246 = arith.mulf %231, %245 : vector<8x256xf32>
    %247 = arith.addf %230, %246 : vector<8x256xf32>
    %c238_i32_13 = arith.constant 238 : i32
    %248 = tpu.dynamic_rotate %163 by %c238_i32_13 dim 1 : vector<8x256xf32>, i32 -> vector<8x256xf32>
    %c14 = arith.constant 14 : index
    %249 = memref.load %arg1[%c14] : memref<108xf32, #tpu.memory_space<smem>>
    %250 = vector.broadcast %249 : f32 to vector<8x256xf32>
    %251 = arith.mulf %248, %250 : vector<8x256xf32>
    %252 = arith.addf %235, %251 : vector<8x256xf32>
    %c41 = arith.constant 41 : index
    %253 = memref.load %arg1[%c41] : memref<108xf32, #tpu.memory_space<smem>>
    %254 = vector.broadcast %253 : f32 to vector<8x256xf32>
    %255 = arith.mulf %248, %254 : vector<8x256xf32>
    %256 = arith.addf %239, %255 : vector<8x256xf32>
    %c68 = arith.constant 68 : index
    %257 = memref.load %arg1[%c68] : memref<108xf32, #tpu.memory_space<smem>>
    %258 = vector.broadcast %257 : f32 to vector<8x256xf32>
    %259 = arith.mulf %248, %258 : vector<8x256xf32>
    %260 = arith.addf %243, %259 : vector<8x256xf32>
    %c95 = arith.constant 95 : index
    %261 = memref.load %arg1[%c95] : memref<108xf32, #tpu.memory_space<smem>>
    %262 = vector.broadcast %261 : f32 to vector<8x256xf32>
    %263 = arith.mulf %248, %262 : vector<8x256xf32>
    %264 = arith.addf %247, %263 : vector<8x256xf32>
    %c224_i32_14 = arith.constant 224 : i32
    %265 = tpu.dynamic_rotate %163 by %c224_i32_14 dim 1 : vector<8x256xf32>, i32 -> vector<8x256xf32>
    %c15 = arith.constant 15 : index
    %266 = memref.load %arg1[%c15] : memref<108xf32, #tpu.memory_space<smem>>
    %267 = vector.broadcast %266 : f32 to vector<8x256xf32>
    %268 = arith.mulf %265, %267 : vector<8x256xf32>
    %269 = arith.addf %252, %268 : vector<8x256xf32>
    %c42 = arith.constant 42 : index
    %270 = memref.load %arg1[%c42] : memref<108xf32, #tpu.memory_space<smem>>
    %271 = vector.broadcast %270 : f32 to vector<8x256xf32>
    %272 = arith.mulf %265, %271 : vector<8x256xf32>
    %273 = arith.addf %256, %272 : vector<8x256xf32>
    %c69 = arith.constant 69 : index
    %274 = memref.load %arg1[%c69] : memref<108xf32, #tpu.memory_space<smem>>
    %275 = vector.broadcast %274 : f32 to vector<8x256xf32>
    %276 = arith.mulf %265, %275 : vector<8x256xf32>
    %277 = arith.addf %260, %276 : vector<8x256xf32>
    %c96 = arith.constant 96 : index
    %278 = memref.load %arg1[%c96] : memref<108xf32, #tpu.memory_space<smem>>
    %279 = vector.broadcast %278 : f32 to vector<8x256xf32>
    %280 = arith.mulf %265, %279 : vector<8x256xf32>
    %281 = arith.addf %264, %280 : vector<8x256xf32>
    %c223_i32_15 = arith.constant 223 : i32
    %282 = tpu.dynamic_rotate %163 by %c223_i32_15 dim 1 : vector<8x256xf32>, i32 -> vector<8x256xf32>
    %c16 = arith.constant 16 : index
    %283 = memref.load %arg1[%c16] : memref<108xf32, #tpu.memory_space<smem>>
    %284 = vector.broadcast %283 : f32 to vector<8x256xf32>
    %285 = arith.mulf %282, %284 : vector<8x256xf32>
    %286 = arith.addf %269, %285 : vector<8x256xf32>
    %c43 = arith.constant 43 : index
    %287 = memref.load %arg1[%c43] : memref<108xf32, #tpu.memory_space<smem>>
    %288 = vector.broadcast %287 : f32 to vector<8x256xf32>
    %289 = arith.mulf %282, %288 : vector<8x256xf32>
    %290 = arith.addf %273, %289 : vector<8x256xf32>
    %c70 = arith.constant 70 : index
    %291 = memref.load %arg1[%c70] : memref<108xf32, #tpu.memory_space<smem>>
    %292 = vector.broadcast %291 : f32 to vector<8x256xf32>
    %293 = arith.mulf %282, %292 : vector<8x256xf32>
    %294 = arith.addf %277, %293 : vector<8x256xf32>
    %c97 = arith.constant 97 : index
    %295 = memref.load %arg1[%c97] : memref<108xf32, #tpu.memory_space<smem>>
    %296 = vector.broadcast %295 : f32 to vector<8x256xf32>
    %297 = arith.mulf %282, %296 : vector<8x256xf32>
    %298 = arith.addf %281, %297 : vector<8x256xf32>
    %c222_i32_16 = arith.constant 222 : i32
    %299 = tpu.dynamic_rotate %163 by %c222_i32_16 dim 1 : vector<8x256xf32>, i32 -> vector<8x256xf32>
    %c17 = arith.constant 17 : index
    %300 = memref.load %arg1[%c17] : memref<108xf32, #tpu.memory_space<smem>>
    %301 = vector.broadcast %300 : f32 to vector<8x256xf32>
    %302 = arith.mulf %299, %301 : vector<8x256xf32>
    %303 = arith.addf %286, %302 : vector<8x256xf32>
    %c44 = arith.constant 44 : index
    %304 = memref.load %arg1[%c44] : memref<108xf32, #tpu.memory_space<smem>>
    %305 = vector.broadcast %304 : f32 to vector<8x256xf32>
    %306 = arith.mulf %299, %305 : vector<8x256xf32>
    %307 = arith.addf %290, %306 : vector<8x256xf32>
    %c71 = arith.constant 71 : index
    %308 = memref.load %arg1[%c71] : memref<108xf32, #tpu.memory_space<smem>>
    %309 = vector.broadcast %308 : f32 to vector<8x256xf32>
    %310 = arith.mulf %299, %309 : vector<8x256xf32>
    %311 = arith.addf %294, %310 : vector<8x256xf32>
    %c98 = arith.constant 98 : index
    %312 = memref.load %arg1[%c98] : memref<108xf32, #tpu.memory_space<smem>>
    %313 = vector.broadcast %312 : f32 to vector<8x256xf32>
    %314 = arith.mulf %299, %313 : vector<8x256xf32>
    %315 = arith.addf %298, %314 : vector<8x256xf32>
    %c0_17 = arith.constant 0 : index
    %c0_18 = arith.constant 0 : index
    %c512 = arith.constant 512 : index
    %316 = vector.load %arg3[%c0_17, %c0_18, %c512] : memref<1x8x768xf32, #tpu.memory_space<vmem>>, vector<1x8x256xf32>
    %317 = vector.shape_cast %316 : vector<1x8x256xf32> to vector<8x256xf32>
    %c18 = arith.constant 18 : index
    %318 = memref.load %arg1[%c18] : memref<108xf32, #tpu.memory_space<smem>>
    %319 = vector.broadcast %318 : f32 to vector<8x256xf32>
    %320 = arith.mulf %317, %319 : vector<8x256xf32>
    %321 = arith.addf %303, %320 : vector<8x256xf32>
    %c45 = arith.constant 45 : index
    %322 = memref.load %arg1[%c45] : memref<108xf32, #tpu.memory_space<smem>>
    %323 = vector.broadcast %322 : f32 to vector<8x256xf32>
    %324 = arith.mulf %317, %323 : vector<8x256xf32>
    %325 = arith.addf %307, %324 : vector<8x256xf32>
    %c72 = arith.constant 72 : index
    %326 = memref.load %arg1[%c72] : memref<108xf32, #tpu.memory_space<smem>>
    %327 = vector.broadcast %326 : f32 to vector<8x256xf32>
    %328 = arith.mulf %317, %327 : vector<8x256xf32>
    %329 = arith.addf %311, %328 : vector<8x256xf32>
    %c99 = arith.constant 99 : index
    %330 = memref.load %arg1[%c99] : memref<108xf32, #tpu.memory_space<smem>>
    %331 = vector.broadcast %330 : f32 to vector<8x256xf32>
    %332 = arith.mulf %317, %331 : vector<8x256xf32>
    %333 = arith.addf %315, %332 : vector<8x256xf32>
    %c255_i32_19 = arith.constant 255 : i32
    %334 = tpu.dynamic_rotate %317 by %c255_i32_19 dim 1 : vector<8x256xf32>, i32 -> vector<8x256xf32>
    %c19 = arith.constant 19 : index
    %335 = memref.load %arg1[%c19] : memref<108xf32, #tpu.memory_space<smem>>
    %336 = vector.broadcast %335 : f32 to vector<8x256xf32>
    %337 = arith.mulf %334, %336 : vector<8x256xf32>
    %338 = arith.addf %321, %337 : vector<8x256xf32>
    %c46 = arith.constant 46 : index
    %339 = memref.load %arg1[%c46] : memref<108xf32, #tpu.memory_space<smem>>
    %340 = vector.broadcast %339 : f32 to vector<8x256xf32>
    %341 = arith.mulf %334, %340 : vector<8x256xf32>
    %342 = arith.addf %325, %341 : vector<8x256xf32>
    %c73 = arith.constant 73 : index
    %343 = memref.load %arg1[%c73] : memref<108xf32, #tpu.memory_space<smem>>
    %344 = vector.broadcast %343 : f32 to vector<8x256xf32>
    %345 = arith.mulf %334, %344 : vector<8x256xf32>
    %346 = arith.addf %329, %345 : vector<8x256xf32>
    %c100 = arith.constant 100 : index
    %347 = memref.load %arg1[%c100] : memref<108xf32, #tpu.memory_space<smem>>
    %348 = vector.broadcast %347 : f32 to vector<8x256xf32>
    %349 = arith.mulf %334, %348 : vector<8x256xf32>
    %350 = arith.addf %333, %349 : vector<8x256xf32>
    %c254_i32_20 = arith.constant 254 : i32
    %351 = tpu.dynamic_rotate %317 by %c254_i32_20 dim 1 : vector<8x256xf32>, i32 -> vector<8x256xf32>
    %c20 = arith.constant 20 : index
    %352 = memref.load %arg1[%c20] : memref<108xf32, #tpu.memory_space<smem>>
    %353 = vector.broadcast %352 : f32 to vector<8x256xf32>
    %354 = arith.mulf %351, %353 : vector<8x256xf32>
    %355 = arith.addf %338, %354 : vector<8x256xf32>
    %c47 = arith.constant 47 : index
    %356 = memref.load %arg1[%c47] : memref<108xf32, #tpu.memory_space<smem>>
    %357 = vector.broadcast %356 : f32 to vector<8x256xf32>
    %358 = arith.mulf %351, %357 : vector<8x256xf32>
    %359 = arith.addf %342, %358 : vector<8x256xf32>
    %c74 = arith.constant 74 : index
    %360 = memref.load %arg1[%c74] : memref<108xf32, #tpu.memory_space<smem>>
    %361 = vector.broadcast %360 : f32 to vector<8x256xf32>
    %362 = arith.mulf %351, %361 : vector<8x256xf32>
    %363 = arith.addf %346, %362 : vector<8x256xf32>
    %c101 = arith.constant 101 : index
    %364 = memref.load %arg1[%c101] : memref<108xf32, #tpu.memory_space<smem>>
    %365 = vector.broadcast %364 : f32 to vector<8x256xf32>
    %366 = arith.mulf %351, %365 : vector<8x256xf32>
    %367 = arith.addf %350, %366 : vector<8x256xf32>
    %c240_i32_21 = arith.constant 240 : i32
    %368 = tpu.dynamic_rotate %317 by %c240_i32_21 dim 1 : vector<8x256xf32>, i32 -> vector<8x256xf32>
    %c21 = arith.constant 21 : index
    %369 = memref.load %arg1[%c21] : memref<108xf32, #tpu.memory_space<smem>>
    %370 = vector.broadcast %369 : f32 to vector<8x256xf32>
    %371 = arith.mulf %368, %370 : vector<8x256xf32>
    %372 = arith.addf %355, %371 : vector<8x256xf32>
    %c48 = arith.constant 48 : index
    %373 = memref.load %arg1[%c48] : memref<108xf32, #tpu.memory_space<smem>>
    %374 = vector.broadcast %373 : f32 to vector<8x256xf32>
    %375 = arith.mulf %368, %374 : vector<8x256xf32>
    %376 = arith.addf %359, %375 : vector<8x256xf32>
    %c75 = arith.constant 75 : index
    %377 = memref.load %arg1[%c75] : memref<108xf32, #tpu.memory_space<smem>>
    %378 = vector.broadcast %377 : f32 to vector<8x256xf32>
    %379 = arith.mulf %368, %378 : vector<8x256xf32>
    %380 = arith.addf %363, %379 : vector<8x256xf32>
    %c102 = arith.constant 102 : index
    %381 = memref.load %arg1[%c102] : memref<108xf32, #tpu.memory_space<smem>>
    %382 = vector.broadcast %381 : f32 to vector<8x256xf32>
    %383 = arith.mulf %368, %382 : vector<8x256xf32>
    %384 = arith.addf %367, %383 : vector<8x256xf32>
    %c239_i32_22 = arith.constant 239 : i32
    %385 = tpu.dynamic_rotate %317 by %c239_i32_22 dim 1 : vector<8x256xf32>, i32 -> vector<8x256xf32>
    %c22 = arith.constant 22 : index
    %386 = memref.load %arg1[%c22] : memref<108xf32, #tpu.memory_space<smem>>
    %387 = vector.broadcast %386 : f32 to vector<8x256xf32>
    %388 = arith.mulf %385, %387 : vector<8x256xf32>
    %389 = arith.addf %372, %388 : vector<8x256xf32>
    %c49 = arith.constant 49 : index
    %390 = memref.load %arg1[%c49] : memref<108xf32, #tpu.memory_space<smem>>
    %391 = vector.broadcast %390 : f32 to vector<8x256xf32>
    %392 = arith.mulf %385, %391 : vector<8x256xf32>
    %393 = arith.addf %376, %392 : vector<8x256xf32>
    %c76 = arith.constant 76 : index
    %394 = memref.load %arg1[%c76] : memref<108xf32, #tpu.memory_space<smem>>
    %395 = vector.broadcast %394 : f32 to vector<8x256xf32>
    %396 = arith.mulf %385, %395 : vector<8x256xf32>
    %397 = arith.addf %380, %396 : vector<8x256xf32>
    %c103 = arith.constant 103 : index
    %398 = memref.load %arg1[%c103] : memref<108xf32, #tpu.memory_space<smem>>
    %399 = vector.broadcast %398 : f32 to vector<8x256xf32>
    %400 = arith.mulf %385, %399 : vector<8x256xf32>
    %401 = arith.addf %384, %400 : vector<8x256xf32>
    %c238_i32_23 = arith.constant 238 : i32
    %402 = tpu.dynamic_rotate %317 by %c238_i32_23 dim 1 : vector<8x256xf32>, i32 -> vector<8x256xf32>
    %c23 = arith.constant 23 : index
    %403 = memref.load %arg1[%c23] : memref<108xf32, #tpu.memory_space<smem>>
    %404 = vector.broadcast %403 : f32 to vector<8x256xf32>
    %405 = arith.mulf %402, %404 : vector<8x256xf32>
    %406 = arith.addf %389, %405 : vector<8x256xf32>
    %c50 = arith.constant 50 : index
    %407 = memref.load %arg1[%c50] : memref<108xf32, #tpu.memory_space<smem>>
    %408 = vector.broadcast %407 : f32 to vector<8x256xf32>
    %409 = arith.mulf %402, %408 : vector<8x256xf32>
    %410 = arith.addf %393, %409 : vector<8x256xf32>
    %c77 = arith.constant 77 : index
    %411 = memref.load %arg1[%c77] : memref<108xf32, #tpu.memory_space<smem>>
    %412 = vector.broadcast %411 : f32 to vector<8x256xf32>
    %413 = arith.mulf %402, %412 : vector<8x256xf32>
    %414 = arith.addf %397, %413 : vector<8x256xf32>
    %c104 = arith.constant 104 : index
    %415 = memref.load %arg1[%c104] : memref<108xf32, #tpu.memory_space<smem>>
    %416 = vector.broadcast %415 : f32 to vector<8x256xf32>
    %417 = arith.mulf %402, %416 : vector<8x256xf32>
    %418 = arith.addf %401, %417 : vector<8x256xf32>
    %c224_i32_24 = arith.constant 224 : i32
    %419 = tpu.dynamic_rotate %317 by %c224_i32_24 dim 1 : vector<8x256xf32>, i32 -> vector<8x256xf32>
    %c24 = arith.constant 24 : index
    %420 = memref.load %arg1[%c24] : memref<108xf32, #tpu.memory_space<smem>>
    %421 = vector.broadcast %420 : f32 to vector<8x256xf32>
    %422 = arith.mulf %419, %421 : vector<8x256xf32>
    %423 = arith.addf %406, %422 : vector<8x256xf32>
    %c51 = arith.constant 51 : index
    %424 = memref.load %arg1[%c51] : memref<108xf32, #tpu.memory_space<smem>>
    %425 = vector.broadcast %424 : f32 to vector<8x256xf32>
    %426 = arith.mulf %419, %425 : vector<8x256xf32>
    %427 = arith.addf %410, %426 : vector<8x256xf32>
    %c78 = arith.constant 78 : index
    %428 = memref.load %arg1[%c78] : memref<108xf32, #tpu.memory_space<smem>>
    %429 = vector.broadcast %428 : f32 to vector<8x256xf32>
    %430 = arith.mulf %419, %429 : vector<8x256xf32>
    %431 = arith.addf %414, %430 : vector<8x256xf32>
    %c105 = arith.constant 105 : index
    %432 = memref.load %arg1[%c105] : memref<108xf32, #tpu.memory_space<smem>>
    %433 = vector.broadcast %432 : f32 to vector<8x256xf32>
    %434 = arith.mulf %419, %433 : vector<8x256xf32>
    %435 = arith.addf %418, %434 : vector<8x256xf32>
    %c223_i32_25 = arith.constant 223 : i32
    %436 = tpu.dynamic_rotate %317 by %c223_i32_25 dim 1 : vector<8x256xf32>, i32 -> vector<8x256xf32>
    %c25 = arith.constant 25 : index
    %437 = memref.load %arg1[%c25] : memref<108xf32, #tpu.memory_space<smem>>
    %438 = vector.broadcast %437 : f32 to vector<8x256xf32>
    %439 = arith.mulf %436, %438 : vector<8x256xf32>
    %440 = arith.addf %423, %439 : vector<8x256xf32>
    %c52 = arith.constant 52 : index
    %441 = memref.load %arg1[%c52] : memref<108xf32, #tpu.memory_space<smem>>
    %442 = vector.broadcast %441 : f32 to vector<8x256xf32>
    %443 = arith.mulf %436, %442 : vector<8x256xf32>
    %444 = arith.addf %427, %443 : vector<8x256xf32>
    %c79 = arith.constant 79 : index
    %445 = memref.load %arg1[%c79] : memref<108xf32, #tpu.memory_space<smem>>
    %446 = vector.broadcast %445 : f32 to vector<8x256xf32>
    %447 = arith.mulf %436, %446 : vector<8x256xf32>
    %448 = arith.addf %431, %447 : vector<8x256xf32>
    %c106 = arith.constant 106 : index
    %449 = memref.load %arg1[%c106] : memref<108xf32, #tpu.memory_space<smem>>
    %450 = vector.broadcast %449 : f32 to vector<8x256xf32>
    %451 = arith.mulf %436, %450 : vector<8x256xf32>
    %452 = arith.addf %435, %451 : vector<8x256xf32>
    %c222_i32_26 = arith.constant 222 : i32
    %453 = tpu.dynamic_rotate %317 by %c222_i32_26 dim 1 : vector<8x256xf32>, i32 -> vector<8x256xf32>
    %c26 = arith.constant 26 : index
    %454 = memref.load %arg1[%c26] : memref<108xf32, #tpu.memory_space<smem>>
    %455 = vector.broadcast %454 : f32 to vector<8x256xf32>
    %456 = arith.mulf %453, %455 : vector<8x256xf32>
    %457 = arith.addf %440, %456 : vector<8x256xf32>
    %c53 = arith.constant 53 : index
    %458 = memref.load %arg1[%c53] : memref<108xf32, #tpu.memory_space<smem>>
    %459 = vector.broadcast %458 : f32 to vector<8x256xf32>
    %460 = arith.mulf %453, %459 : vector<8x256xf32>
    %461 = arith.addf %444, %460 : vector<8x256xf32>
    %c80 = arith.constant 80 : index
    %462 = memref.load %arg1[%c80] : memref<108xf32, #tpu.memory_space<smem>>
    %463 = vector.broadcast %462 : f32 to vector<8x256xf32>
    %464 = arith.mulf %453, %463 : vector<8x256xf32>
    %465 = arith.addf %448, %464 : vector<8x256xf32>
    %c107 = arith.constant 107 : index
    %466 = memref.load %arg1[%c107] : memref<108xf32, #tpu.memory_space<smem>>
    %467 = vector.broadcast %466 : f32 to vector<8x256xf32>
    %468 = arith.mulf %453, %467 : vector<8x256xf32>
    %469 = arith.addf %452, %468 : vector<8x256xf32>
    %c0_27 = arith.constant 0 : index
    %c0_28 = arith.constant 0 : index
    %c0_29 = arith.constant 0 : index
    %470 = vector.load %arg4[%c0_27, %c0_28, %c0_29] : memref<1x8x1024xf32, #tpu.memory_space<vmem>>, vector<1x8x256xf32>
    %471 = vector.shape_cast %470 : vector<1x8x256xf32> to vector<8x256xf32>
    %472 = vector.shape_cast %457 : vector<8x256xf32> to vector<1x8x256xf32>
    tpu.vector_store %arg4[%c0_27, %c0_28, %c0_29], %472 {strides = array<i32>} : memref<1x8x1024xf32, #tpu.memory_space<vmem>>, vector<1x8x256xf32>,
    %c0_30 = arith.constant 0 : index
    %c0_31 = arith.constant 0 : index
    %c256_32 = arith.constant 256 : index
    %473 = vector.load %arg4[%c0_30, %c0_31, %c256_32] : memref<1x8x1024xf32, #tpu.memory_space<vmem>>, vector<1x8x256xf32>
    %474 = vector.shape_cast %473 : vector<1x8x256xf32> to vector<8x256xf32>
    %475 = vector.shape_cast %461 : vector<8x256xf32> to vector<1x8x256xf32>
    tpu.vector_store %arg4[%c0_30, %c0_31, %c256_32], %475 {strides = array<i32>} : memref<1x8x1024xf32, #tpu.memory_space<vmem>>, vector<1x8x256xf32>,
    %c0_33 = arith.constant 0 : index
    %c0_34 = arith.constant 0 : index
    %c512_35 = arith.constant 512 : index
    %476 = vector.load %arg4[%c0_33, %c0_34, %c512_35] : memref<1x8x1024xf32, #tpu.memory_space<vmem>>, vector<1x8x256xf32>
    %477 = vector.shape_cast %476 : vector<1x8x256xf32> to vector<8x256xf32>
    %478 = vector.shape_cast %465 : vector<8x256xf32> to vector<1x8x256xf32>
    tpu.vector_store %arg4[%c0_33, %c0_34, %c512_35], %478 {strides = array<i32>} : memref<1x8x1024xf32, #tpu.memory_space<vmem>>, vector<1x8x256xf32>,
    %c0_36 = arith.constant 0 : index
    %c0_37 = arith.constant 0 : index
    %c768 = arith.constant 768 : index
    %479 = vector.load %arg4[%c0_36, %c0_37, %c768] : memref<1x8x1024xf32, #tpu.memory_space<vmem>>, vector<1x8x256xf32>
    %480 = vector.shape_cast %479 : vector<1x8x256xf32> to vector<8x256xf32>
    %481 = vector.shape_cast %469 : vector<8x256xf32> to vector<1x8x256xf32>
    tpu.vector_store %arg4[%c0_36, %c0_37, %c768], %481 {strides = array<i32>} : memref<1x8x1024xf32, #tpu.memory_space<vmem>>, vector<1x8x256xf32>,
    return
  }
  func.func @transform_0(%arg0: i32) -> i32 {
    %c0_i32 = arith.constant 0 : i32
    %c0_i32_0 = arith.constant 0 : i32
    return %c0_i32 : i32
  }
  func.func @transform_1(%arg0: i32) -> i32 {
    %c0_i32 = arith.constant 0 : i32
    %c0_i32_0 = arith.constant 0 : i32
    return %c0_i32 : i32
  }
  func.func @transform_2(%arg0: i32) -> (i32, i32, i32) {
    %c0_i32 = arith.constant 0 : i32
    %c0_i32_0 = arith.constant 0 : i32
    %c0_i32_1 = arith.constant 0 : i32
    return %arg0, %c0_i32, %c0_i32_0 : i32, i32, i32
  }
  func.func @transform_3(%arg0: i32) -> (i32, i32, i32) {
    %c0_i32 = arith.constant 0 : i32
    %c0_i32_0 = arith.constant 0 : i32
    %c0_i32_1 = arith.constant 0 : i32
    return %arg0, %c0_i32, %c0_i32_0 : i32, i32, i32
  }
}

</mosaic_0001>

<bundles_post_ra>
// kernel: tpu_custom_call.1
= control target key start
LH: loop header
LB: loop body
LE: loop exit
PB: predicated region body
PF: predicated region fallthrough
CT: control target
= control target key end

     0   :  { %s2204_s0 = inlined_call_operand.hbm [shape: f32[108], index: 0, kind: input, shape index: {}]   ;;  %s2205_s1 = inlined_call_operand.vmem [shape: f32[4], index: 1, kind: input, shape index: {}]   ;;  %s2206_s2 = inlined_call_operand.hbm [shape: f32[1,8,768], index: 2, kind: input, shape index: {}]   ;;  %s2207_s3 = inlined_call_operand.hbm [shape: f32[1,8,1024], index: 3, kind: output, shape index: {}]  }
   0x1   :  { %2331 = sst [smem:[#allocation93_spill]] %s2207_s3 }
   0x2   :  { %8 = vsyncpa [#allocation5], 0 }
   0x3   :  { %9 = vsyncpa [#allocation6], 0 }
   0x4   :  { %10 = vsyncpa [#allocation3], 0 }
   0x5   :  { %11 = vsyncpa [#allocation4], 0  ;;  %s26_s14 = sshll.u32 %s2205_s1, 4  ;;  %s1013_s17 = scalar_lea.hbm %s2204_s0, 16  ;;  %s27_s14 = int_to_ptr.vmem [resolvable:$true] %s26_s14 }
   0x6   :  { %p1014_p0 = scmp.ne.s32.totalorder %s2204_s0, %s1013_s17  ;;  %p1017_p1 = scmp.lt.u32.totalorder %s1013_s17, %s2204_s0 }
   0x8   :  { %p1019_p2 = pnand %p1017_p1, %p1014_p0 }
   0xa   :  { %1022 = shalt.err (!%p1019_p2)
}
   0xb   :  { %s1087_s22 = smov [#allocation2]   ;;  %s1023_s1 = scalar_lea.vmem %s27_s14, 16 }
   0xc   :  { %19 = dma.hbm_to_smem %s2204_s0, 16, %s1087_s22, [#allocation5]  }
   0xd   :  { %p1024_p3 = scmp.ne.s32.totalorder %s27_s14, %s1023_s1  ;;  %p1028_p4 = scmp.lt.s32.totalorder %s27_s14, %s27_s14 }
   0xe   :  { %p1029_p5 = scmp.lt.s32.totalorder %s1023_s1, %s1023_s1 }
  0x10   :  { %p1030_p6 = por %p1029_p5, %p1028_p4 }
  0x12   :  { %p1031_p7 = pnand %p1030_p6, %p1024_p3 }
  0x14   :  { %1034 = shalt.err (!%p1031_p7)
}
  0x15   :  { %s1088_s25 = smov [#allocation7]   ;;  %s1089_s26 = smov [#allocation8]  }
  0x16   :  { %29 = dma.vmem_to_smem %s27_s14, 16, %s1088_s25, [#allocation6]  }
  0x17   :  { %s36_s27 = sshll.u32 %s1089_s26, 4  ;;  %s1035_s30 = scalar_lea.hbm %s2206_s2, 768  ;;  %s37_s27 = int_to_ptr.vmem [resolvable:$true] %s36_s27 }
  0x18   :  { %p1036_p8 = scmp.ne.s32.totalorder %s2206_s2, %s1035_s30  ;;  %p1039_p9 = scmp.lt.u32.totalorder %s1035_s30, %s2206_s2 }
  0x1a   :  { %p1041_p10 = pnand %p1039_p9, %p1036_p8 }
  0x1c   :  { %1044 = shalt.err (!%p1041_p10)
}
  0x1d   :  { %s1045_s7 = scalar_lea.vmem %s37_s27, 768  ;;  %p1050_p12 = scmp.lt.s32.totalorder %s37_s27, %s37_s27 }
  0x1e   :  { %p1046_p11 = scmp.ne.s32.totalorder %s37_s27, %s1045_s7  ;;  %p1051_p13 = scmp.lt.s32.totalorder %s1045_s7, %s1045_s7 }
  0x20   :  { %p1052_p0 = por %p1051_p13, %p1050_p12 }
  0x22   :  { %p1053_p1 = pnand %p1052_p0, %p1046_p11 }
  0x24   :  { %1056 = shalt.err (!%p1053_p1)
}
  0x25   :  { %39 = dma.hbm_to_vmem [thread:$0]  %s2206_s2, 768, %s37_s27, [#allocation3]  }
  0x26   :  { %1079 = dma.done.wait [#allocation5], 16  }
  0x27   :  { %1080 = vsyncadd [#allocation5], 4294967280 }
  0x28   :  { %1081 = dma.done.wait [#allocation6], 16  }
  0x29   :  { %1082 = vsyncadd [#allocation6], 4294967280 }
  0x2a   :  { %1083 = dma.done.wait [#allocation3], 768  }
  0x2b   :  { %1084 = vsyncadd [#allocation3], 4294966528 }
  0x2c   :  { %49 = sfence }
  0x2d   :  { %v1146_v0 = vld [vmem:[#allocation8] sm:$0xff]  ;;  %s1090_s10 = smov 126   ;;  %s1091_s11 = smov 127   ;;  %v1152_v1 = vld [vmem:[#allocation8 + $0x8] sm:$0xff]  ;;  %v1182_v2 = vld [vmem:[#allocation8 + $0x18] sm:$0xff]  ;;  %v88_v6 = vlaneseq }
  0x2e   :  { %117 = vrot.lane.b32.xlu1 %v1146_v0, %s1090_s10  ;;  %84 = vrot.lane.b32.xlu0 %v1146_v0, %s1091_s11  ;;  %s2218_s2 = smov 112   ;;  %s2216_s12 = smov 111   ;;  %v1184_v3 = vld [vmem:[#allocation8 + $0x10] sm:$0xff]  ;;  %v1242_v4 = vld [vmem:[#allocation8 + $0x28] sm:$0xff]  ;;  %v1244_v5 = vld [vmem:[#allocation8 + $0x20] sm:$0xff] }
  0x2f   :  { %s2214_s13 = smov 110   ;;  %s2212_s14 = smov 96   ;;  %v1367_v12 = vand.u32 127, %v88_v6 }
  0x30   :  { %s2210_s15 = smov 95   ;;  %s2208_s16 = smov 94  }
  0x31   :  { %s1210_s17 = sld [smem:[#allocation2 + $0x2]]  ;;  %s1212_s18 = sld [smem:[#allocation2 + $0x1d]]  ;;  %vm121_vm0 = vcmp.lt.s32.totalorder %v1367_v12, 126  ;;  %vm90_vm1 = vcmp.lt.s32.totalorder %v1367_v12, 127  ;;  %vm152_vm2 = vcmp.lt.s32.totalorder %v1367_v12, 112  ;;  %vm183_vm3 = vcmp.lt.s32.totalorder %v1367_v12, 111 }
  0x32   :  { %119 = vrot.lane.b32.xlu1 %v1152_v1, %s1090_s10  ;;  %86 = vrot.lane.b32.xlu0 %v1152_v1, %s1091_s11  ;;  %s1218_s19 = sld [smem:[#allocation2 + $0x38]]  ;;  %s1220_s20 = sld [smem:[#allocation2 + $0x53]]  ;;  %vm214_vm4 = vcmp.lt.s32.totalorder %v1367_v12, 110  ;;  %vm245_vm5 = vcmp.lt.s32.totalorder %v1367_v12, 96  ;;  %vm276_vm6 = vcmp.lt.s32.totalorder %v1367_v12, 95  ;;  %vm307_vm7 = vcmp.lt.s32.totalorder %v1367_v12, 94 }
  0x33   :  { %s1222_s21 = sld [smem:[#allocation2]]  ;;  %s1224_s22 = sld [smem:[#allocation2 + $0x1b]] }
  0x34   :  { %s1226_s23 = sld [smem:[#allocation2 + $0x36]]  ;;  %s1228_s24 = sld [smem:[#allocation2 + $0x51]] }
  0x35   :  { %s1230_s1 = sld [smem:[#allocation2 + $0x1]]  ;;  %s1232_s25 = sld [smem:[#allocation2 + $0x1c]] }
  0x36   :  { %150 = vrot.lane.b32.xlu1 %v1152_v1, %s2218_s2  ;;  %148 = vrot.lane.b32.xlu0 %v1146_v0, %s2218_s2  ;;  %s1238_s26 = sld [smem:[#allocation2 + $0x37]]  ;;  %s1240_s27 = sld [smem:[#allocation2 + $0x52]] }
  0x37   :  { %2332 = sst [smem:[#allocation14_spill]] %s1210_s17  ;;  %s1248_s29 = sld [smem:[#allocation7 + $0x1]]  ;;  %v125_v9 = vstv %s1210_s17  ;;  %v131_v10 = vstv %s1212_s18 }
  0x38   :  { %2333 = sst [smem:[#allocation15_spill]] %s1212_s18  ;;  %s1246_s28 = sld [smem:[#allocation7]]  ;;  %v137_v13 = vstv %s1218_s19  ;;  %v143_v14 = vstv %s1220_s20 }
  0x39   :  { %2334 = sst [smem:[#allocation16_spill]] %s1218_s19  ;;  %s1252_s4 = sld [smem:[#allocation7 + $0x3]]  ;;  %v61_v7 = vstv %s1222_s21  ;;  %v67_v8 = vstv %s1224_s22 }
  0x3a   :  { %181 = vrot.lane.b32.xlu1 %v1152_v1, %s2216_s12  ;;  %179 = vrot.lane.b32.xlu0 %v1146_v0, %s2216_s12  ;;  %2335 = sst [smem:[#allocation17_spill]] %s1220_s20  ;;  %s1250_s30 = sld [smem:[#allocation7 + $0x2]]  ;;  %v73_v11 = vstv %s1226_s23  ;;  %v63_v15 = vmul.f32 %v61_v7, %v1152_v1  ;;  %v69_v16 = vmul.f32 %v67_v8, %v1152_v1  ;;  %v79_v17 = vstv %s1228_s24 }
  0x3b   :  { %2336 = sst [smem:[#allocation18_spill]] %s1230_s1  ;;  %s1254_s5 = sld [smem:[#allocation2 + $0x3]]  ;;  %v62_v18 = vmul.f32 %v61_v7, %v1146_v0  ;;  %v68_v19 = vmul.f32 %v67_v8, %v1146_v0  ;;  %v75_v20 = vmul.f32 %v73_v11, %v1152_v1  ;;  %v74_v23 = vmul.f32 %v73_v11, %v1146_v0 }
  0x3c   :  { %2337 = sst [smem:[#allocation19_spill]] %s1232_s25  ;;  %s1256_s0 = sld [smem:[#allocation2 + $0x1e]]  ;;  %v94_v24 = vstv %s1230_s1  ;;  %v100_v25 = vstv %s1232_s25  ;;  %v106_v26 = vstv %s1238_s26  ;;  %v81_v28 = vmul.f32 %v79_v17, %v1152_v1 }
  0x3d   :  { %2338 = sst [smem:[#allocation20_spill]] %s1238_s26  ;;  %s1262_s6 = sld [smem:[#allocation2 + $0x39]]  ;;  %v53_v22 = vstv %s1248_s29  ;;  %v112_v29 = vstv %s1240_s27  ;;  %v80_v31 = vmul.f32 %v79_v17, %v1146_v0 }
  0x3e   :  { %212 = vrot.lane.b32.xlu1 %v1152_v1, %s2214_s13  ;;  %210 = vrot.lane.b32.xlu0 %v1146_v0, %s2214_s13  ;;  %2339 = sst [smem:[#allocation21_spill]] %s1240_s27  ;;  %s1264_s7 = sld [smem:[#allocation2 + $0x54]]  ;;  %v51_v21 = vstv %s1246_s28  ;;  %v1416_v34 = vadd.f32 %v68_v19, %v53_v22  ;;  %v1418_v35 = vadd.f32 %v69_v16, %v53_v22 }
  0x3f   :  { %s1266_s8 = sld [smem:[#allocation2 + $0x4]]  ;;  %s1268_s9 = sld [smem:[#allocation2 + $0x1f]]  ;;  %v57_v30 = vstv %s1252_s4  ;;  %v1412_v32 = vadd.f32 %v62_v18, %v51_v21  ;;  %v1414_v33 = vadd.f32 %v63_v15, %v51_v21 }
  0x40   :  { %s1288_s3 = sld [smem:[#allocation2 + $0x21]]  ;;  %s1372_s21 = sld [smem:[#allocation2 + $0x43]]  ;;  %v55_v27 = vstv %s1250_s30  ;;  %v1446_v44 = vadd.f32 %v80_v31, %v57_v30  ;;  %v1448_v45 = vadd.f32 %v81_v28, %v57_v30 }
  0x41   :  { %2340 = sst [smem:[#allocation22_spill]] %s1254_s5  ;;  %s1374_s22 = sld [smem:[#allocation2 + $0x5e]]  ;;  %v1424_v36 = vadd.f32 %v74_v23, %v55_v27  ;;  %v1426_v37 = vadd.f32 %v75_v20, %v55_v27  ;;  %v156_v38 = vstv %s1254_s5 }
  0x42   :  { %243 = vrot.lane.b32.xlu1 %v1152_v1, %s2212_s14  ;;  %241 = vrot.lane.b32.xlu0 %v1146_v0, %s2212_s14  ;;  %2341 = sst [smem:[#allocation23_spill]] %s1256_s0  ;;  %s1388_s20 = sld [smem:[#allocation2 + $0x44]]  ;;  %v162_v39 = vstv %s1256_s0 }
  0x43   :  { %2342 = sst [smem:[#allocation24_spill]] %s1262_s6  ;;  %s1382_s23 = sld [smem:[#allocation2 + $0x29]]  ;;  %v168_v40 = vstv %s1262_s6 }
  0x44   :  { %2343 = sst [smem:[#allocation25_spill]] %s1264_s7  ;;  %s1390_s19 = sld [smem:[#allocation2 + $0x5f]]  ;;  %v174_v41 = vstv %s1264_s7 }
  0x45   :  { %2344 = sst [smem:[#allocation26_spill]] %s1266_s8  ;;  %s1396_s24 = sld [smem:[#allocation2 + $0xf]]  ;;  %v187_v42 = vstv %s1266_s8 }
  0x46   :  { %274 = vrot.lane.b32.xlu1 %v1152_v1, %s2210_s15  ;;  %272 = vrot.lane.b32.xlu0 %v1146_v0, %s2210_s15  ;;  %2345 = sst [smem:[#allocation27_spill]] %s1268_s9  ;;  %s2358_s9 = smov 112  }
  0x47   :  { %2353 = sst [smem:[#allocation35_spill]] %s1288_s3  ;;  %s1308_s3 = sld [smem:[#allocation2 + $0x23]] }
  0x48   :  { %2383 = sst [smem:[#allocation61_spill]] %s1372_s21  ;;  %s1398_s18 = sld [smem:[#allocation2 + $0x2a]] }
  0x49   :  { %2384 = sst [smem:[#allocation62_spill]] %s1374_s22  ;;  %s2391_s17 = smov 95  }
  0x4a   :  { %305 = vrot.lane.b32.xlu1 %v1152_v1, %s2208_s16  ;;  %303 = vrot.lane.b32.xlu0 %v1146_v0, %s2208_s16  ;;  %2386 = sst [smem:[#allocation64_spill]] %s1382_s23  ;;  %s1408_s28 = sld [smem:[#allocation2 + $0x45]] }
  0x4b   :  { %2387 = sst [smem:[#allocation65_spill]] %s1388_s20  ;;  %s1410_s29 = sld [smem:[#allocation2 + $0x60]] }
  0x4c   :  { %2388 = sst [smem:[#allocation66_spill]] %s1390_s19  ;;  %s2394_s30 = sld [smem:[#allocation27_spill]] }
  0x4d   :  { %2362 = sst [smem:[#allocation43_spill]] %s1308_s3  ;;  %s1326_s3 = sld [smem:[#allocation2 + $0xa]] }
  0x4e   :  { %362 = vrot.lane.b32.xlu1 %v1182_v2, %s1091_s11  ;;  %360 = vrot.lane.b32.xlu0 %v1184_v3, %s1091_s11  ;;  %2389 = sst [smem:[#allocation67_spill]] %s1396_s24  ;;  %s1422_s4 = sld [smem:[#allocation2 + $0x2b]] }
  0x4f   :  { %2390 = sst [smem:[#allocation68_spill]] %s1398_s18  ;;  %s1440_s19 = sld [smem:[#allocation2 + $0x2c]] }
  0x50   :  { %2392 = sst [smem:[#allocation69_spill]] %s1408_s28  ;;  %s1430_s25 = sld [smem:[#allocation2 + $0x46]] }
  0x51   :  { %2393 = sst [smem:[#allocation70_spill]] %s1410_s29  ;;  %s1432_s29 = sld [smem:[#allocation2 + $0x61]] }
  0x52   :  { %392 = vrot.lane.b32.xlu1 %v1182_v2, %s1090_s10  ;;  %390 = vrot.lane.b32.xlu0 %v1184_v3, %s1090_s10  ;;  %v193_v43 = vstv %s2394_s30  ;;  %s2408_s20 = smov 94   ;;  %s1452_s7 = sld [smem:[#allocation2 + $0x47]] }
  0x53   :  { %2367 = sst [smem:[#allocation47_spill]] %s1326_s3  ;;  %s1454_s6 = sld [smem:[#allocation2 + $0x62]] }
  0x54   :  { %s1342_s3 = sld [smem:[#allocation2 + $0x41]]  ;;  %2396 = sst [smem:[#allocation72_spill]] %s1422_s4 }
  0x55   :  { %s1438_s4 = sld [smem:[#allocation2 + $0x11]]  ;;  %2407 = sst [smem:[#allocation76_spill]] %s1440_s19 }
  0x56   :  { %422 = vrot.lane.b32.xlu1 %v1182_v2, %s2218_s2  ;;  %420 = vrot.lane.b32.xlu0 %v1184_v3, %s2218_s2  ;;  %s1286_s2 = sld [smem:[#allocation2 + $0x6]]  ;;  %2399 = sst [smem:[#allocation73_spill]] %s1430_s25 }
  0x57   :  { %2401 = sst [smem:[#allocation74_spill]] %s1432_s29  ;;  %s1460_s25 = sld [smem:[#allocation2 + $0x12]] }
  0x58   :  { %2414 = sst [smem:[#allocation77_spill]] %s1452_s7  ;;  %s1470_s28 = sld [smem:[#allocation2 + $0x63]] }
  0x59   :  { %2415 = sst [smem:[#allocation78_spill]] %s1454_s6  ;;  %s1478_s18 = sld [smem:[#allocation2 + $0x2e]] }
  0x5a   :  { %452 = vrot.lane.b32.xlu1 %v1182_v2, %s2216_s12  ;;  %450 = vrot.lane.b32.xlu0 %v1184_v3, %s2216_s12  ;;  %s1284_s12 = sld [smem:[#allocation2 + $0x56]]  ;;  %2374 = sst [smem:[#allocation53_spill]] %s1342_s3 }
  0x5b   :  { %s1361_s3 = sld [smem:[#allocation2 + $0x28]]  ;;  %2405 = sst [smem:[#allocation75_spill]] %s1438_s4 }
  0x5c   :  { %2352 = sst [smem:[#allocation34_spill]] %s1286_s2  ;;  %s1306_s2 = sld [smem:[#allocation2 + $0x8]] }
  0x5d   :  { %s1468_s6 = sld [smem:[#allocation2 + $0x48]]  ;;  %s1484_s29 = sld [smem:[#allocation2 + $0x49]] }
  0x5e   :  { %482 = vrot.lane.b32.xlu1 %v1182_v2, %s2214_s13  ;;  %480 = vrot.lane.b32.xlu0 %v1184_v3, %s2214_s13  ;;  %s1276_s13 = sld [smem:[#allocation2 + $0x20]]  ;;  %s1486_s0 = sld [smem:[#allocation2 + $0x64]] }
  0x5f   :  { %s1494_s8 = sld [smem:[#allocation2 + $0x2f]]  ;;  %s1522_s30 = sld [smem:[#allocation2 + $0x30]] }
  0x60   :  { %2351 = sst [smem:[#allocation33_spill]] %s1284_s12  ;;  %s1304_s12 = sld [smem:[#allocation2 + $0x58]] }
  0x61   :  { %2381 = sst [smem:[#allocation60_spill]] %s1361_s3  ;;  %s1532_s5 = sld [smem:[#allocation2 + $0x4b]] }
  0x62   :  { %512 = vrot.lane.b32.xlu1 %v1182_v2, %s2212_s14  ;;  %510 = vrot.lane.b32.xlu0 %v1184_v3, %s2212_s14  ;;  %s1274_s14 = sld [smem:[#allocation2 + $0x5]]  ;;  %2361 = sst [smem:[#allocation42_spill]] %s1306_s2 }
  0x63   :  { %s1324_s2 = sld [smem:[#allocation2 + $0x5a]]  ;;  %s1534_s24 = sld [smem:[#allocation2 + $0x66]] }
  0x64   :  { %2349 = sst [smem:[#allocation31_spill]] %s1276_s13  ;;  %s1296_s13 = sld [smem:[#allocation2 + $0x22]] }
  0x65   :  { %2435 = sst [smem:[#allocation82_spill]] %s1522_s30  ;;  %s1566_s3 = sld [smem:[#allocation2 + $0x68]] }
  0x66   :  { %542 = vrot.lane.b32.xlu1 %v1182_v2, %s2210_s15  ;;  %540 = vrot.lane.b32.xlu0 %v1184_v3, %s2210_s15  ;;  %s1272_s15 = sld [smem:[#allocation2 + $0x55]]  ;;  %2360 = sst [smem:[#allocation41_spill]] %s1304_s12 }
  0x67   :  { %s1332_s12 = sld [smem:[#allocation2 + $0x5b]]  ;;  %2436 = sst [smem:[#allocation83_spill]] %s1532_s5 }
  0x68   :  { %2348 = sst [smem:[#allocation30_spill]] %s1274_s14  ;;  %s1294_s14 = sld [smem:[#allocation2 + $0x7]] }
  0x69   :  { %s2400_s1 = sld [smem:[#allocation30_spill]]  ;;  %v355_v7 = vstv %s1324_s2  ;;  %2437 = sst [smem:[#allocation84_spill]] %s1534_s24 }
  0x6a   :  { %572 = vrot.lane.b32.xlu1 %v1182_v2, %s2208_s16  ;;  %570 = vrot.lane.b32.xlu0 %v1184_v3, %s2208_s16  ;;  %s1270_s16 = sld [smem:[#allocation2 + $0x3a]]  ;;  %2357 = sst [smem:[#allocation39_spill]] %s1296_s13  ;;  %v1525_v21 = vmul.f32 %v355_v7, %v1184_v3  ;;  %v1528_v22 = vmul.f32 %v355_v7, %v1182_v2  ;;  %v621_v7 = vstv %s1470_s28 }
  0x6b   :  { %s1316_s13 = sld [smem:[#allocation2 + $0x24]]  ;;  %s1550_s2 = sld [smem:[#allocation2 + $0x67]] }
  0x6c   :  { %2347 = sst [smem:[#allocation29_spill]] %s1272_s15  ;;  %s1548_s24 = sld [smem:[#allocation2 + $0x4c]] }
  0x6d   :  { %s1292_s15 = sld [smem:[#allocation2 + $0x57]]  ;;  %2370 = sst [smem:[#allocation50_spill]] %s1332_s12 }
  0x6e   :  { %628 = vrot.lane.b32.xlu1 %v1242_v4, %s1091_s11  ;;  %626 = vrot.lane.b32.xlu0 %v1244_v5, %s1091_s11  ;;  %s1282_s11 = sld [smem:[#allocation2 + $0x3b]]  ;;  %2356 = sst [smem:[#allocation38_spill]] %s1294_s14 }
  0x6f   :  { %s1314_s14 = sld [smem:[#allocation2 + $0x9]]  ;;  %s1347_s12 = sld [smem:[#allocation2 + $0xc]]  ;;  %v218_v48 = vstv %s2400_s1 }
  0x70   :  { %2346 = sst [smem:[#allocation28_spill]] %s1270_s16  ;;  %s1290_s16 = sld [smem:[#allocation2 + $0x3c]] }
  0x71   :  { %2365 = sst [smem:[#allocation46_spill]] %s1316_s13  ;;  %s1336_s13 = sld [smem:[#allocation2 + $0x26]] }
  0x72   :  { %658 = vrot.lane.b32.xlu1 %v1242_v4, %s1090_s10  ;;  %656 = vrot.lane.b32.xlu0 %v1244_v5, %s1090_s10  ;;  %s1302_s10 = sld [smem:[#allocation2 + $0x3d]]  ;;  %s2397_s27 = sld [smem:[#allocation28_spill]] }
  0x73   :  { %2355 = sst [smem:[#allocation37_spill]] %s1292_s15  ;;  %s1312_s15 = sld [smem:[#allocation2 + $0x59]] }
  0x74   :  { %2350 = sst [smem:[#allocation32_spill]] %s1282_s11  ;;  %s2366_s11 = smov 111  }
  0x75   :  { %2376 = sst [smem:[#allocation55_spill]] %s1347_s12  ;;  %s2398_s26 = sld [smem:[#allocation29_spill]]  ;;  %v337_v58 = vstv %s1314_s14 }
  0x76   :  { %2354 = sst [smem:[#allocation36_spill]] %s1290_s16  ;;  %688 = vrot.lane.b32.xlu1 %v1242_v4, %s2358_s9  ;;  %686 = vrot.lane.b32.xlu0 %v1244_v5, %s2358_s9  ;;  %s1322_s9 = sld [smem:[#allocation2 + $0x3f]]  ;;  %v1497_v8 = vmul.f32 %v337_v58, %v1184_v3  ;;  %v1500_v11 = vmul.f32 %v337_v58, %v1182_v2  ;;  %v615_v58 = vstv %s1468_s6 }
  0x77   :  { %s1310_s16 = sld [smem:[#allocation2 + $0x3e]]  ;;  %s2416_s19 = sld [smem:[#allocation46_spill]]  ;;  %v1619_v28 = vmul.f32 %v615_v58, %v1244_v5 }
  0x78   :  { %2359 = sst [smem:[#allocation40_spill]] %s1302_s10  ;;  %s1334_s10 = sld [smem:[#allocation2 + $0xb]]  ;;  %v199_v46 = vstv %s2397_s27 }
  0x79   :  { %2364 = sst [smem:[#allocation45_spill]] %s1312_s15  ;;  %s1330_s15 = sld [smem:[#allocation2 + $0x40]] }
  0x7a   :  { %718 = vrot.lane.b32.xlu1 %v1242_v4, %s2366_s11  ;;  %716 = vrot.lane.b32.xlu0 %v1244_v5, %s2366_s11  ;;  %2372 = sst [smem:[#allocation52_spill]] %s1336_s13  ;;  %s2373_s11 = smov 110  }
  0x7b   :  { %s1352_s13 = sld [smem:[#allocation2 + $0x42]]  ;;  %v205_v47 = vstv %s2398_s26  ;;  %s1492_s14 = sld [smem:[#allocation2 + $0x14]] }
  0x7c   :  { %v349_v63 = vstv %s1322_s9  ;;  %2426 = sst [smem:[#allocation46_spill]] %s1494_s8  ;;  %s1508_s1 = sld [smem:[#allocation2 + $0x4a]] }
  0x7d   :  { %2363 = sst [smem:[#allocation44_spill]] %s1310_s16  ;;  %s1328_s16 = sld [smem:[#allocation2 + $0x25]]  ;;  %v343_v59 = vstv %s2416_s19  ;;  %v1513_v17 = vmul.f32 %v349_v63, %v1184_v3  ;;  %v1516_v18 = vmul.f32 %v349_v63, %v1182_v2 }
  0x7e   :  { %2371 = sst [smem:[#allocation51_spill]] %s1334_s10  ;;  %748 = vrot.lane.b32.xlu1 %v1242_v4, %s2373_s11  ;;  %746 = vrot.lane.b32.xlu0 %v1244_v5, %s2373_s11  ;;  %v1503_v15 = vmul.f32 %v343_v59, %v1184_v3  ;;  %v1506_v16 = vmul.f32 %v343_v59, %v1182_v2  ;;  %s1542_s8 = sld [smem:[#allocation2 + $0x31]]  ;;  %v603_v59 = vstv %s1460_s25  ;;  %v1625_v2 = vmul.f32 %v621_v7, %v1244_v5 }
  0x7f   :  { %2369 = sst [smem:[#allocation49_spill]] %s1330_s15  ;;  %s1349_s15 = sld [smem:[#allocation2 + $0x27]]  ;;  %v1603_v31 = vmul.f32 %v603_v59, %v1244_v5  ;;  %v1606_v30 = vmul.f32 %v603_v59, %v1242_v4  ;;  %v1622_v59 = vmul.f32 %v615_v58, %v1242_v4 }
  0x80   :  { %s1354_s10 = sld [smem:[#allocation2 + $0x5d]]  ;;  %2447 = sst [smem:[#allocation87_spill]] %s1550_s2 }
  0x81   :  { %2378 = sst [smem:[#allocation57_spill]] %s1352_s13  ;;  %s1359_s11 = sld [smem:[#allocation2 + $0xd]] }
  0x82   :  { %2430 = sst [smem:[#allocation79_spill]] %s1508_s1  ;;  %s1510_s26 = sld [smem:[#allocation2 + $0x65]] }
  0x83   :  { %2368 = sst [smem:[#allocation48_spill]] %s1328_s16  ;;  %s1344_s16 = sld [smem:[#allocation2 + $0x5c]] }
  0x84   :  { %2442 = sst [smem:[#allocation86_spill]] %s1542_s8  ;;  %s1556_s8 = sld [smem:[#allocation2 + $0x17]] }
  0x85   :  { %2377 = sst [smem:[#allocation56_spill]] %s1349_s15  ;;  %s1564_s12 = sld [smem:[#allocation2 + $0x4d]] }
  0x86   :  { %2379 = sst [smem:[#allocation58_spill]] %s1354_s10  ;;  %s1558_s15 = sld [smem:[#allocation2 + $0x32]] }
  0x87   :  { %2380 = sst [smem:[#allocation59_spill]] %s1359_s11  ;;  %s1572_s22 = sld [smem:[#allocation2 + $0x18]] }
  0x88   :  { %2432 = sst [smem:[#allocation80_spill]] %s1510_s26  ;;  %s1540_s26 = sld [smem:[#allocation2 + $0x16]] }
  0x89   :  { %2375 = sst [smem:[#allocation54_spill]] %s1344_s16  ;;  %s2382_s16 = smov 96  }
  0x8a   :  { %778 = vrot.lane.b32.xlu1 %v1242_v4, %s2382_s16  ;;  %776 = vrot.lane.b32.xlu0 %v1244_v5, %s2382_s16  ;;  %s1380_s16 = sld [smem:[#allocation2 + $0xe]]  ;;  %2454 = sst [smem:[#allocation89_spill]] %s1566_s3 }
  0x8b   :  { %s1574_s11 = sld [smem:[#allocation2 + $0x33]]  ;;  %s1580_s1 = sld [smem:[#allocation2 + $0x4e]] }
  0x8c   :  { %2451 = sst [smem:[#allocation88_spill]] %s1558_s15  ;;  %s1582_s30 = sld [smem:[#allocation2 + $0x69]] }
  0x8d   :  { %s1588_s27 = sld [smem:[#allocation2 + $0x19]]  ;;  %s1590_s9 = sld [smem:[#allocation2 + $0x34]] }
  0x8e   :  { %808 = vrot.lane.b32.xlu1 %v1242_v4, %s2391_s17  ;;  %806 = vrot.lane.b32.xlu0 %v1244_v5, %s2391_s17  ;;  %s1420_s17 = sld [smem:[#allocation2 + $0x10]]  ;;  %2440 = sst [smem:[#allocation85_spill]] %s1540_s26 }
  0x8f   :  { %s1598_s25 = sld [smem:[#allocation2 + $0x4f]]  ;;  %s2461_s6 = sld [smem:[#allocation46_spill]] }
  0x90   :  { %2385 = sst [smem:[#allocation63_spill]] %s1380_s16  ;;  %s1462_s16 = sld [smem:[#allocation2 + $0x2d]] }
  0x91   :  { %2458 = sst [smem:[#allocation90_spill]] %s1580_s1  ;;  %s2462_s28 = sld [smem:[#allocation79_spill]] }
  0x92   :  { %838 = vrot.lane.b32.xlu1 %v1242_v4, %s2408_s20  ;;  %836 = vrot.lane.b32.xlu0 %v1244_v5, %s2408_s20  ;;  %s1520_s20 = sld [smem:[#allocation2 + $0x15]]  ;;  %s1614_s7 = sld [smem:[#allocation2 + $0x1a]] }
  0x93   :  { %2459 = sst [smem:[#allocation91_spill]] %s1582_s30  ;;  %s2466_s13 = sld [smem:[#allocation82_spill]] }
  0x94   :  { %2395 = sst [smem:[#allocation71_spill]] %s1420_s17  ;;  %s1476_s17 = sld [smem:[#allocation2 + $0x13]] }
  0x95   :  { %s1616_s21 = sld [smem:[#allocation2 + $0x35]]  ;;  %s2468_s26 = sld [smem:[#allocation84_spill]] }
  0x96   :  { %v609_v63 = vstv %s1462_s16  ;;  %s1600_s16 = sld [smem:[#allocation2 + $0x6a]]  ;;  %s2467_s10 = sld [smem:[#allocation83_spill]] }
  0x97   :  { %v1609_v3 = vmul.f32 %v609_v63, %v1244_v5  ;;  %v1612_v27 = vmul.f32 %v609_v63, %v1242_v4  ;;  %v1628_v63 = vmul.f32 %v621_v7, %v1242_v4  ;;  %s1630_s23 = sld [smem:[#allocation2 + $0x50]]  ;;  %s1632_s4 = sld [smem:[#allocation2 + $0x6b]] }
  0x98   :  { %2434 = sst [smem:[#allocation81_spill]] %s1520_s20  ;;  %s2490_s15 = sld [smem:[#allocation31_spill]] }
  0x99   :  { %s2464_s20 = sld [smem:[#allocation81_spill]]  ;;  %s2491_s1 = sld [smem:[#allocation32_spill]] }
  0x9a   :  { %s2492_s5 = sld [smem:[#allocation33_spill]]  ;;  %s2496_s30 = sld [smem:[#allocation35_spill]] }
  0x9b   :  { %2465 = sst [smem:[#allocation46_spill]] %s1616_s21  ;;  %s2501_s2 = sld [smem:[#allocation36_spill]] }
  0x9c   :  { %2460 = sst [smem:[#allocation92_spill]] %s1600_s16  ;;  %s2471_s21 = sld [smem:[#allocation86_spill]] }
  0x9d   :  { %2469 = sst [smem:[#allocation79_spill]] %s1630_s23  ;;  %s2472_s19 = sld [smem:[#allocation46_spill]] }
  0x9e   :  { %s2495_s23 = sld [smem:[#allocation34_spill]]  ;;  %s2502_s16 = sld [smem:[#allocation37_spill]] }
  0x9f   :  { %s2511_s3 = sld [smem:[#allocation38_spill]] }
  0xa0   :  { %v118_v20 = vpop.permute.xlu1 %117  ;;  %v85_v19 = vpop.permute.xlu0 %84 }
  0xa4   :  { %v120_v0 = vpop.permute.xlu1 %119  ;;  %v87_v23 = vpop.permute.xlu0 %86 }
  0xa5   :  { %v122_v4 = vsel %vm121_vm0, %v118_v20, %v120_v0  ;;  %v123_v7 = vsel %vm121_vm0, %v120_v0, %v118_v20  ;;  %v91_v1 = vsel %vm90_vm1, %v85_v19, %v87_v23  ;;  %v92_v60 = vsel %vm90_vm1, %v87_v23, %v85_v19 }
  0xa6   :  { %v126_v57 = vmul.f32 %v125_v9, %v122_v4  ;;  %v127_v61 = vmul.f32 %v125_v9, %v123_v7  ;;  %v132_v62 = vmul.f32 %v131_v10, %v122_v4  ;;  %v133_v5 = vmul.f32 %v131_v10, %v123_v7 }
  0xa7   :  { %v138_v0 = vmul.f32 %v137_v13, %v122_v4  ;;  %v139_v20 = vmul.f32 %v137_v13, %v123_v7  ;;  %v144_v6 = vmul.f32 %v143_v14, %v122_v4  ;;  %v145_v58 = vmul.f32 %v143_v14, %v123_v7 }
  0xa8   :  { %v95_v19 = vmul.f32 %v94_v24, %v91_v1  ;;  %v96_v23 = vmul.f32 %v94_v24, %v92_v60  ;;  %v101_v56 = vmul.f32 %v100_v25, %v91_v1  ;;  %v102_v9 = vmul.f32 %v100_v25, %v92_v60  ;;  %v151_v55 = vpop.permute.xlu1 %150  ;;  %v149_v54 = vpop.permute.xlu0 %148 }
  0xa9   :  { %v107_v10 = vmul.f32 %v106_v26, %v91_v1  ;;  %v108_v53 = vmul.f32 %v106_v26, %v92_v60  ;;  %v113_v13 = vmul.f32 %v112_v29, %v91_v1  ;;  %v114_v4 = vmul.f32 %v112_v29, %v92_v60 }
  0xaa   :  { %v97_v14 = vadd.f32 %v95_v19, %v1412_v32  ;;  %v98_v7 = vadd.f32 %v96_v23, %v1414_v33  ;;  %v103_v24 = vadd.f32 %v101_v56, %v1416_v34  ;;  %v104_v52 = vadd.f32 %v102_v9, %v1418_v35 }
  0xab   :  { %v109_v25 = vadd.f32 %v107_v10, %v1424_v36  ;;  %v110_v51 = vadd.f32 %v108_v53, %v1426_v37  ;;  %v115_v50 = vadd.f32 %v113_v13, %v1446_v44  ;;  %v116_v26 = vadd.f32 %v114_v4, %v1448_v45 }
  0xac   :  { %v128_v49 = vadd.f32 %v126_v57, %v97_v14  ;;  %v129_v1 = vadd.f32 %v127_v61, %v98_v7  ;;  %v134_v29 = vadd.f32 %v132_v62, %v103_v24  ;;  %v135_v32 = vadd.f32 %v133_v5, %v104_v52  ;;  %v182_v33 = vpop.permute.xlu1 %181  ;;  %v180_v34 = vpop.permute.xlu0 %179 }
  0xad   :  { %v140_v35 = vadd.f32 %v138_v0, %v109_v25  ;;  %v141_v36 = vadd.f32 %v139_v20, %v110_v51  ;;  %v146_v37 = vadd.f32 %v144_v6, %v115_v50  ;;  %v147_v44 = vadd.f32 %v145_v58, %v116_v26 }
  0xae   :  { %v153_v45 = vsel %vm152_vm2, %v149_v54, %v151_v55  ;;  %v154_v52 = vsel %vm152_vm2, %v151_v55, %v149_v54  ;;  %v184_v53 = vsel %vm183_vm3, %v180_v34, %v182_v33  ;;  %v185_v56 = vsel %vm183_vm3, %v182_v33, %v180_v34 }
  0xaf   :  { %v157_v57 = vmul.f32 %v156_v38, %v153_v45  ;;  %v158_v60 = vmul.f32 %v156_v38, %v154_v52  ;;  %v163_v51 = vmul.f32 %v162_v39, %v153_v45  ;;  %v164_v50 = vmul.f32 %v162_v39, %v154_v52 }
  0xb0   :  { %v169_v61 = vmul.f32 %v168_v40, %v153_v45  ;;  %v170_v54 = vmul.f32 %v168_v40, %v154_v52  ;;  %v175_v55 = vmul.f32 %v174_v41, %v153_v45  ;;  %v176_v62 = vmul.f32 %v174_v41, %v154_v52  ;;  %v213_v6 = vpop.permute.xlu1 %212  ;;  %v211_v38 = vpop.permute.xlu0 %210 }
  0xb1   :  { %v159_v58 = vadd.f32 %v157_v57, %v128_v49  ;;  %v160_v5 = vadd.f32 %v158_v60, %v129_v1  ;;  %v165_v39 = vadd.f32 %v163_v51, %v134_v29  ;;  %v166_v0 = vadd.f32 %v164_v50, %v135_v32 }
  0xb2   :  { %v171_v20 = vadd.f32 %v169_v61, %v140_v35  ;;  %v172_v19 = vadd.f32 %v170_v54, %v141_v36  ;;  %v177_v23 = vadd.f32 %v175_v55, %v146_v37  ;;  %v178_v9 = vadd.f32 %v176_v62, %v147_v44 }
  0xb3   :  { %v188_v40 = vmul.f32 %v187_v42, %v184_v53  ;;  %v189_v10 = vmul.f32 %v187_v42, %v185_v56  ;;  %v194_v13 = vmul.f32 %v193_v43, %v184_v53  ;;  %v195_v41 = vmul.f32 %v193_v43, %v185_v56 }
  0xb4   :  { %v200_v4 = vmul.f32 %v199_v46, %v184_v53  ;;  %v201_v14 = vmul.f32 %v199_v46, %v185_v56  ;;  %v206_v49 = vmul.f32 %v205_v47, %v184_v53  ;;  %v207_v7 = vmul.f32 %v205_v47, %v185_v56  ;;  %v244_v24 = vpop.permute.xlu1 %243  ;;  %v242_v25 = vpop.permute.xlu0 %241 }
  0xb5   :  { %v190_v26 = vadd.f32 %v188_v40, %v159_v58  ;;  %v191_v1 = vadd.f32 %v189_v10, %v160_v5  ;;  %v196_v42 = vadd.f32 %v194_v13, %v165_v39  ;;  %v197_v29 = vadd.f32 %v195_v41, %v166_v0 }
  0xb6   :  { %v202_v43 = vadd.f32 %v200_v4, %v171_v20  ;;  %v203_v46 = vadd.f32 %v201_v14, %v172_v19  ;;  %v208_v47 = vadd.f32 %v206_v49, %v177_v23  ;;  %v209_v32 = vadd.f32 %v207_v7, %v178_v9 }
  0xb7   :  { %v215_v33 = vsel %vm214_vm4, %v211_v38, %v213_v6  ;;  %v216_v34 = vsel %vm214_vm4, %v213_v6, %v211_v38  ;;  %v246_v35 = vsel %vm245_vm5, %v242_v25, %v244_v24  ;;  %v247_v36 = vsel %vm245_vm5, %v244_v24, %v242_v25 }
  0xb8   :  { %v219_v37 = vmul.f32 %v218_v48, %v215_v33  ;;  %v220_v44 = vmul.f32 %v218_v48, %v216_v34  ;;  %v2493_v45 = vstv %s2490_s15  ;;  %v275_v57 = vpop.permute.xlu1 %274  ;;  %v273_v60 = vpop.permute.xlu0 %272  ;;  %v2497_v51 = vstv %s2491_s1  ;;  %s2512_s15 = sld [smem:[#allocation39_spill]]  ;;  %s2513_s1 = sld [smem:[#allocation40_spill]] }
  0xb9   :  { %v225_v52 = vmul.f32 %v2493_v45, %v215_v33  ;;  %v2494_v53 = vmov %v2493_v45  ;;  %v231_v50 = vmul.f32 %v2497_v51, %v215_v33  ;;  %v2498_v61 = vmov %v2497_v51 }
  0xba   :  { %v226_v56 = vmul.f32 %v2494_v53, %v216_v34  ;;  %v232_v54 = vmul.f32 %v2498_v61, %v216_v34  ;;  %v2499_v55 = vstv %s2492_s5  ;;  %v221_v48 = vadd.f32 %v219_v37, %v190_v26  ;;  %s2514_s5 = sld [smem:[#allocation41_spill]] }
  0xbb   :  { %v237_v62 = vmul.f32 %v2499_v55, %v215_v33  ;;  %v2500_v6 = vmov %v2499_v55  ;;  %v222_v58 = vadd.f32 %v220_v44, %v191_v1  ;;  %v227_v5 = vadd.f32 %v225_v52, %v196_v42 }
  0xbc   :  { %v238_v38 = vmul.f32 %v2500_v6, %v216_v34  ;;  %v228_v39 = vadd.f32 %v226_v56, %v197_v29  ;;  %v233_v0 = vadd.f32 %v231_v50, %v202_v43  ;;  %v234_v20 = vadd.f32 %v232_v54, %v203_v46  ;;  %v306_v7 = vpop.permute.xlu1 %305  ;;  %v304_v24 = vpop.permute.xlu0 %303 }
  0xbd   :  { %v239_v19 = vadd.f32 %v237_v62, %v208_v47  ;;  %v2503_v9 = vstv %s2495_s23  ;;  %v2505_v41 = vstv %s2496_s30  ;;  %v2507_v25 = vstv %s2501_s2  ;;  %s2519_s23 = sld [smem:[#allocation42_spill]]  ;;  %s2522_s30 = sld [smem:[#allocation43_spill]] }
  0xbe   :  { %v240_v23 = vadd.f32 %v238_v38, %v209_v32  ;;  %v250_v40 = vmul.f32 %v2503_v9, %v246_v35  ;;  %v2504_v10 = vmov %v2503_v9  ;;  %v256_v4 = vmul.f32 %v2505_v41, %v246_v35  ;;  %s2525_s2 = sld [smem:[#allocation44_spill]] }
  0xbf   :  { %v251_v13 = vmul.f32 %v2504_v10, %v247_v36  ;;  %v2506_v14 = vmov %v2505_v41  ;;  %v262_v26 = vmul.f32 %v2507_v25, %v246_v35  ;;  %v2508_v1 = vmov %v2507_v25 }
  0xc0   :  { %v257_v49 = vmul.f32 %v2506_v14, %v247_v36  ;;  %v263_v33 = vmul.f32 %v2508_v1, %v247_v36  ;;  %v2509_v42 = vstv %s2502_s16  ;;  %v252_v47 = vadd.f32 %v250_v40, %v221_v48  ;;  %v363_v50 = vpop.permute.xlu1 %362  ;;  %v361_v61 = vpop.permute.xlu0 %360  ;;  %s2526_s16 = sld [smem:[#allocation45_spill]] }
  0xc1   :  { %v268_v29 = vmul.f32 %v2509_v42, %v246_v35  ;;  %v2510_v43 = vmov %v2509_v42  ;;  %v253_v32 = vadd.f32 %v251_v13, %v222_v58  ;;  %v258_v34 = vadd.f32 %v256_v4, %v227_v5 }
  0xc2   :  { %v269_v46 = vmul.f32 %v2510_v43, %v247_v36  ;;  %v259_v37 = vadd.f32 %v257_v49, %v228_v39  ;;  %v264_v44 = vadd.f32 %v262_v26, %v233_v0  ;;  %v265_v45 = vadd.f32 %v263_v33, %v234_v20 }
  0xc3   :  { %v270_v52 = vadd.f32 %v268_v29, %v239_v19  ;;  %v277_v35 = vsel %vm276_vm6, %v273_v60, %v275_v57  ;;  %v278_v36 = vsel %vm276_vm6, %v275_v57, %v273_v60  ;;  %v308_v56 = vsel %vm307_vm7, %v304_v24, %v306_v7 }
  0xc4   :  { %v271_v53 = vadd.f32 %v269_v46, %v240_v23  ;;  %v309_v51 = vsel %vm307_vm7, %v306_v7, %v304_v24  ;;  %v2515_v54 = vstv %s2511_s3  ;;  %v2517_v38 = vstv %s2512_s15  ;;  %v393_v24 = vpop.permute.xlu1 %392  ;;  %v391_v25 = vpop.permute.xlu0 %390  ;;  %s2535_s3 = sld [smem:[#allocation47_spill]]  ;;  %s2536_s15 = sld [smem:[#allocation48_spill]] }
  0xc5   :  { %v281_v55 = vmul.f32 %v2515_v54, %v277_v35  ;;  %v2516_v62 = vmov %v2515_v54  ;;  %v287_v48 = vmul.f32 %v2517_v38, %v277_v35  ;;  %v2518_v58 = vmov %v2517_v38 }
  0xc6   :  { %v282_v6 = vmul.f32 %v2516_v62, %v278_v36  ;;  %v288_v5 = vmul.f32 %v2518_v58, %v278_v36  ;;  %v2520_v39 = vstv %s2513_s1  ;;  %v2523_v20 = vstv %s2514_s5  ;;  %s2537_s1 = sld [smem:[#allocation49_spill]]  ;;  %s2538_s5 = sld [smem:[#allocation50_spill]] }
  0xc7   :  { %v293_v57 = vmul.f32 %v2520_v39, %v277_v35  ;;  %v2521_v60 = vmov %v2520_v39  ;;  %v299_v19 = vmul.f32 %v2523_v20, %v277_v35  ;;  %v2524_v23 = vmov %v2523_v20 }
  0xc8   :  { %v294_v0 = vmul.f32 %v2521_v60, %v278_v36  ;;  %v300_v9 = vmul.f32 %v2524_v23, %v278_v36  ;;  %v283_v40 = vadd.f32 %v281_v55, %v252_v47  ;;  %v284_v10 = vadd.f32 %v282_v6, %v253_v32  ;;  %v421_v39 = vpop.permute.xlu0 %420 }
  0xc9   :  { %v289_v13 = vadd.f32 %v287_v48, %v258_v34  ;;  %v290_v41 = vadd.f32 %v288_v5, %v259_v37  ;;  %v295_v4 = vadd.f32 %v293_v57, %v264_v44  ;;  %v301_v49 = vadd.f32 %v299_v19, %v270_v52  ;;  %v423_v5 = vpop.permute.xlu1 %422 }
  0xca   :  { %v296_v14 = vadd.f32 %v294_v0, %v265_v45  ;;  %v302_v7 = vadd.f32 %v300_v9, %v271_v53  ;;  %v2527_v26 = vstv %s2519_s23  ;;  %v2529_v29 = vstv %s2522_s30  ;;  %s2543_s23 = sld [smem:[#allocation51_spill]]  ;;  %s2544_s30 = sld [smem:[#allocation52_spill]] }
  0xcb   :  { %v312_v1 = vmul.f32 %v2527_v26, %v308_v56  ;;  %v2528_v33 = vmov %v2527_v26  ;;  %v318_v43 = vmul.f32 %v2529_v29, %v308_v56  ;;  %v2530_v46 = vmov %v2529_v29 }
  0xcc   :  { %v313_v42 = vmul.f32 %v2528_v33, %v309_v51  ;;  %v319_v35 = vmul.f32 %v2530_v46, %v309_v51  ;;  %v2531_v47 = vstv %s2525_s2  ;;  %v2533_v34 = vstv %s2526_s16  ;;  %s2549_s2 = sld [smem:[#allocation53_spill]]  ;;  %s2550_s16 = sld [smem:[#allocation54_spill]] }
  0xcd   :  { %v324_v36 = vmul.f32 %v2531_v47, %v308_v56  ;;  %v2532_v32 = vmov %v2531_v47  ;;  %v330_v37 = vmul.f32 %v2533_v34, %v308_v56  ;;  %v2534_v44 = vmov %v2533_v34 }
  0xce   :  { %v325_v54 = vmul.f32 %v2532_v32, %v309_v51  ;;  %v331_v45 = vmul.f32 %v2534_v44, %v309_v51  ;;  %v314_v52 = vadd.f32 %v312_v1, %v283_v40  ;;  %v315_v53 = vadd.f32 %v313_v42, %v284_v10 }
  0xcf   :  { %v320_v55 = vadd.f32 %v318_v43, %v289_v13  ;;  %v321_v62 = vadd.f32 %v319_v35, %v290_v41  ;;  %v326_v6 = vadd.f32 %v324_v36, %v295_v4  ;;  %v332_v48 = vadd.f32 %v330_v37, %v301_v49  ;;  %v453_v41 = vpop.permute.xlu1 %452  ;;  %v451_v4 = vpop.permute.xlu0 %450 }
  0xd0   :  { %v327_v38 = vadd.f32 %v325_v54, %v296_v14  ;;  %v333_v58 = vadd.f32 %v331_v45, %v302_v7  ;;  %v340_v57 = vadd.f32 %v1497_v8, %v314_v52  ;;  %v341_v56 = vadd.f32 %v1500_v11, %v315_v53 }
  0xd1   :  { %v346_v51 = vadd.f32 %v1503_v15, %v320_v55  ;;  %v347_v60 = vadd.f32 %v1506_v16, %v321_v62  ;;  %v352_v0 = vadd.f32 %v1513_v17, %v326_v6  ;;  %v358_v19 = vadd.f32 %v1525_v21, %v332_v48 }
  0xd2   :  { %v353_v20 = vadd.f32 %v1516_v18, %v327_v38  ;;  %v359_v23 = vadd.f32 %v1528_v22, %v333_v58  ;;  %v364_v8 = vsel %vm90_vm1, %v361_v61, %v363_v50  ;;  %v365_v11 = vsel %vm90_vm1, %v363_v50, %v361_v61 }
  0xd3   :  { %v394_v15 = vsel %vm121_vm0, %v391_v25, %v393_v24  ;;  %v395_v16 = vsel %vm121_vm0, %v393_v24, %v391_v25  ;;  %v2539_v17 = vstv %s2535_s3  ;;  %v2541_v10 = vstv %s2536_s15  ;;  %v483_v53 = vpop.permute.xlu1 %482  ;;  %v481_v55 = vpop.permute.xlu0 %480  ;;  %s2559_s3 = sld [smem:[#allocation55_spill]]  ;;  %s2560_s15 = sld [smem:[#allocation56_spill]] }
  0xd4   :  { %v368_v9 = vmul.f32 %v2539_v17, %v364_v8  ;;  %v2540_v18 = vmov %v2539_v17  ;;  %v374_v21 = vmul.f32 %v2541_v10, %v364_v8  ;;  %v2542_v13 = vmov %v2541_v10 }
  0xd5   :  { %v369_v40 = vmul.f32 %v2540_v18, %v365_v11  ;;  %v375_v22 = vmul.f32 %v2542_v13, %v365_v11  ;;  %v2545_v50 = vstv %s2537_s1  ;;  %v2547_v7 = vstv %s2538_s5  ;;  %s2561_s1 = sld [smem:[#allocation57_spill]]  ;;  %s2562_s5 = sld [smem:[#allocation58_spill]] }
  0xd6   :  { %v380_v61 = vmul.f32 %v2545_v50, %v364_v8  ;;  %v2546_v14 = vmov %v2545_v50  ;;  %v386_v24 = vmul.f32 %v2547_v7, %v364_v8  ;;  %v2548_v25 = vmov %v2547_v7 }
  0xd7   :  { %v381_v49 = vmul.f32 %v2546_v14, %v365_v11  ;;  %v387_v26 = vmul.f32 %v2548_v25, %v365_v11  ;;  %v370_v1 = vadd.f32 %v368_v9, %v340_v57  ;;  %v371_v33 = vadd.f32 %v369_v40, %v341_v56  ;;  %v513_v40 = vpop.permute.xlu1 %512  ;;  %v511_v10 = vpop.permute.xlu0 %510 }
  0xd8   :  { %v376_v42 = vadd.f32 %v374_v21, %v346_v51  ;;  %v377_v29 = vadd.f32 %v375_v22, %v347_v60  ;;  %v382_v43 = vadd.f32 %v380_v61, %v352_v0  ;;  %v388_v35 = vadd.f32 %v386_v24, %v358_v19 }
  0xd9   :  { %v383_v46 = vadd.f32 %v381_v49, %v353_v20  ;;  %v389_v47 = vadd.f32 %v387_v26, %v359_v23  ;;  %v2551_v36 = vstv %s2543_s23  ;;  %v2553_v37 = vstv %s2544_s30  ;;  %s2567_s23 = sld [smem:[#allocation59_spill]]  ;;  %s2570_s30 = sld [smem:[#allocation60_spill]] }
  0xda   :  { %v398_v32 = vmul.f32 %v2551_v36, %v394_v15  ;;  %v2552_v54 = vmov %v2551_v36  ;;  %v404_v44 = vmul.f32 %v2553_v37, %v394_v15  ;;  %v2554_v45 = vmov %v2553_v37 }
  0xdb   :  { %v399_v34 = vmul.f32 %v2552_v54, %v395_v16  ;;  %v405_v52 = vmul.f32 %v2554_v45, %v395_v16  ;;  %v2555_v62 = vstv %s2549_s2  ;;  %v2557_v58 = vstv %s2550_s16  ;;  %s2573_s2 = sld [smem:[#allocation61_spill]]  ;;  %s2574_s16 = sld [smem:[#allocation62_spill]]  ;;  %v541_v54 = vpop.permute.xlu0 %540 }
  0xdc   :  { %v410_v6 = vmul.f32 %v2555_v62, %v394_v15  ;;  %v2556_v38 = vmov %v2555_v62  ;;  %v416_v57 = vmul.f32 %v2557_v58, %v394_v15  ;;  %v2558_v56 = vmov %v2557_v58 }
  0xdd   :  { %v411_v48 = vmul.f32 %v2556_v38, %v395_v16  ;;  %v417_v51 = vmul.f32 %v2558_v56, %v395_v16  ;;  %v400_v60 = vadd.f32 %v398_v32, %v370_v1  ;;  %v401_v0 = vadd.f32 %v399_v34, %v371_v33  ;;  %v543_v32 = vpop.permute.xlu1 %542 }
  0xde   :  { %v406_v20 = vadd.f32 %v404_v44, %v376_v42  ;;  %v407_v19 = vadd.f32 %v405_v52, %v377_v29  ;;  %v412_v23 = vadd.f32 %v410_v6, %v382_v43  ;;  %v418_v11 = vadd.f32 %v416_v57, %v388_v35 }
  0xdf   :  { %v413_v8 = vadd.f32 %v411_v48, %v383_v46  ;;  %v419_v17 = vadd.f32 %v417_v51, %v389_v47  ;;  %v424_v15 = vsel %vm152_vm2, %v421_v39, %v423_v5  ;;  %v425_v16 = vsel %vm152_vm2, %v423_v5, %v421_v39 }
  0xe0   :  { %v454_v9 = vsel %vm183_vm3, %v451_v4, %v453_v41  ;;  %v455_v18 = vsel %vm183_vm3, %v453_v41, %v451_v4  ;;  %v2563_v21 = vstv %s2559_s3  ;;  %v2565_v61 = vstv %s2560_s15  ;;  %s2583_s3 = sld [smem:[#allocation63_spill]]  ;;  %s2584_s15 = sld [smem:[#allocation64_spill]] }
  0xe1   :  { %v428_v13 = vmul.f32 %v2563_v21, %v424_v15  ;;  %v2564_v22 = vmov %v2563_v21  ;;  %v434_v14 = vmul.f32 %v2565_v61, %v424_v15  ;;  %v2566_v49 = vmov %v2565_v61 }
  0xe2   :  { %v429_v50 = vmul.f32 %v2564_v22, %v425_v16  ;;  %v435_v7 = vmul.f32 %v2566_v49, %v425_v16  ;;  %v2568_v24 = vstv %s2561_s1  ;;  %v2571_v26 = vstv %s2562_s5  ;;  %s2585_s1 = sld [smem:[#allocation65_spill]]  ;;  %s2586_s5 = sld [smem:[#allocation66_spill]] }
  0xe3   :  { %v440_v5 = vmul.f32 %v2568_v24, %v424_v15  ;;  %v2569_v39 = vmov %v2568_v24  ;;  %v446_v41 = vmul.f32 %v2571_v26, %v424_v15  ;;  %v2572_v4 = vmov %v2571_v26 }
  0xe4   :  { %v441_v25 = vmul.f32 %v2569_v39, %v425_v16  ;;  %v447_v1 = vmul.f32 %v2572_v4, %v425_v16  ;;  %v430_v33 = vadd.f32 %v428_v13, %v400_v60  ;;  %v431_v42 = vadd.f32 %v429_v50, %v401_v0  ;;  %v573_v13 = vpop.permute.xlu1 %572 }
  0xe5   :  { %v436_v29 = vadd.f32 %v434_v14, %v406_v20  ;;  %v437_v43 = vadd.f32 %v435_v7, %v407_v19  ;;  %v442_v46 = vadd.f32 %v440_v5, %v412_v23  ;;  %v448_v47 = vadd.f32 %v446_v41, %v418_v11 }
  0xe6   :  { %v443_v35 = vadd.f32 %v441_v25, %v413_v8  ;;  %v449_v36 = vadd.f32 %v447_v1, %v419_v17  ;;  %v2575_v34 = vstv %s2567_s23  ;;  %v2577_v52 = vstv %s2570_s30  ;;  %s2591_s23 = sld [smem:[#allocation67_spill]]  ;;  %s2594_s30 = sld [smem:[#allocation68_spill]] }
  0xe7   :  { %v458_v37 = vmul.f32 %v2575_v34, %v454_v9  ;;  %v2576_v44 = vmov %v2575_v34  ;;  %v464_v62 = vmul.f32 %v2577_v52, %v454_v9  ;;  %v2578_v6 = vmov %v2577_v52 }
  0xe8   :  { %v459_v45 = vmul.f32 %v2576_v44, %v455_v18  ;;  %v465_v38 = vmul.f32 %v2578_v6, %v455_v18  ;;  %v2579_v48 = vstv %s2573_s2  ;;  %v2581_v51 = vstv %s2574_s16  ;;  %s2597_s2 = sld [smem:[#allocation69_spill]]  ;;  %s2598_s16 = sld [smem:[#allocation70_spill]] }
  0xe9   :  { %v470_v58 = vmul.f32 %v2579_v48, %v454_v9  ;;  %v2580_v57 = vmov %v2579_v48  ;;  %v476_v60 = vmul.f32 %v2581_v51, %v454_v9  ;;  %v2582_v0 = vmov %v2581_v51  ;;  %v571_v9 = vpop.permute.xlu0 %570 }
  0xea   :  { %v471_v56 = vmul.f32 %v2580_v57, %v455_v18  ;;  %v477_v20 = vmul.f32 %v2582_v0, %v455_v18  ;;  %v460_v19 = vadd.f32 %v458_v37, %v430_v33  ;;  %v461_v23 = vadd.f32 %v459_v45, %v431_v42 }
  0xeb   :  { %v466_v8 = vadd.f32 %v464_v62, %v436_v29  ;;  %v467_v11 = vadd.f32 %v465_v38, %v437_v43  ;;  %v472_v17 = vadd.f32 %v470_v58, %v442_v46  ;;  %v478_v16 = vadd.f32 %v476_v60, %v448_v47 }
  0xec   :  { %v473_v15 = vadd.f32 %v471_v56, %v443_v35  ;;  %v479_v21 = vadd.f32 %v477_v20, %v449_v36  ;;  %v484_v18 = vsel %vm214_vm4, %v481_v55, %v483_v53  ;;  %v485_v22 = vsel %vm214_vm4, %v483_v53, %v481_v55  ;;  %v1952_v35 = vpop.permute.xlu1 %628 }
  0xed   :  { %v514_v50 = vsel %vm245_vm5, %v511_v10, %v513_v40  ;;  %v515_v61 = vsel %vm245_vm5, %v513_v40, %v511_v10  ;;  %v2587_v14 = vstv %s2583_s3  ;;  %v2589_v5 = vstv %s2584_s15  ;;  %v1954_v47 = vpop.permute.xlu0 %626  ;;  %s2607_s3 = sld [smem:[#allocation71_spill]]  ;;  %s2608_s15 = sld [smem:[#allocation72_spill]] }
  0xee   :  { %v488_v49 = vmul.f32 %v2587_v14, %v484_v18  ;;  %v2588_v7 = vmov %v2587_v14  ;;  %v494_v39 = vmul.f32 %v2589_v5, %v484_v18  ;;  %v2590_v25 = vmov %v2589_v5 }
  0xef   :  { %v489_v24 = vmul.f32 %v2588_v7, %v485_v22  ;;  %v495_v26 = vmul.f32 %v2590_v25, %v485_v22  ;;  %v2592_v41 = vstv %s2585_s1  ;;  %v2595_v55 = vstv %s2586_s5  ;;  %s2609_s1 = sld [smem:[#allocation73_spill]]  ;;  %s2610_s5 = sld [smem:[#allocation74_spill]] }
  0xf0   :  { %v500_v4 = vmul.f32 %v2592_v41, %v484_v18  ;;  %v2593_v1 = vmov %v2592_v41  ;;  %v506_v33 = vmul.f32 %v2595_v55, %v484_v18  ;;  %v2596_v42 = vmov %v2595_v55 }
  0xf1   :  { %v501_v53 = vmul.f32 %v2593_v1, %v485_v22  ;;  %v507_v40 = vmul.f32 %v2596_v42, %v485_v22  ;;  %v490_v10 = vadd.f32 %v488_v49, %v460_v19  ;;  %v491_v29 = vadd.f32 %v489_v24, %v461_v23  ;;  %v659_v49 = vpop.permute.xlu1 %658 }
  0xf2   :  { %v496_v43 = vadd.f32 %v494_v39, %v466_v8  ;;  %v497_v46 = vadd.f32 %v495_v26, %v467_v11  ;;  %v502_v36 = vadd.f32 %v500_v4, %v472_v17  ;;  %v508_v37 = vadd.f32 %v506_v33, %v478_v16 }
  0xf3   :  { %v503_v34 = vadd.f32 %v501_v53, %v473_v15  ;;  %v509_v44 = vadd.f32 %v507_v40, %v479_v21  ;;  %v2599_v45 = vstv %s2591_s23  ;;  %v2601_v38 = vstv %s2594_s30  ;;  %s2613_s23 = sld [smem:[#allocation75_spill]]  ;;  %s2616_s30 = sld [smem:[#allocation76_spill]] }
  0xf4   :  { %v518_v52 = vmul.f32 %v2599_v45, %v514_v50  ;;  %v2600_v62 = vmov %v2599_v45  ;;  %v524_v48 = vmul.f32 %v2601_v38, %v514_v50  ;;  %v2602_v58 = vmov %v2601_v38 }
  0xf5   :  { %v519_v6 = vmul.f32 %v2600_v62, %v515_v61  ;;  %v525_v57 = vmul.f32 %v2602_v58, %v515_v61  ;;  %v2603_v56 = vstv %s2597_s2  ;;  %v2605_v20 = vstv %s2598_s16  ;;  %s2621_s2 = sld [smem:[#allocation77_spill]]  ;;  %s2622_s16 = sld [smem:[#allocation78_spill]] }
  0xf6   :  { %v530_v51 = vmul.f32 %v2603_v56, %v514_v50  ;;  %v2604_v60 = vmov %v2603_v56  ;;  %v536_v19 = vmul.f32 %v2605_v20, %v514_v50  ;;  %v2606_v23 = vmov %v2605_v20  ;;  %v657_v50 = vpop.permute.xlu0 %656 }
  0xf7   :  { %v531_v0 = vmul.f32 %v2604_v60, %v515_v61  ;;  %v537_v8 = vmul.f32 %v2606_v23, %v515_v61  ;;  %v520_v11 = vadd.f32 %v518_v52, %v490_v10  ;;  %v521_v17 = vadd.f32 %v519_v6, %v491_v29 }
  0xf8   :  { %v526_v15 = vadd.f32 %v524_v48, %v496_v43  ;;  %v527_v16 = vadd.f32 %v525_v57, %v497_v46  ;;  %v532_v21 = vadd.f32 %v530_v51, %v502_v36  ;;  %v538_v22 = vadd.f32 %v536_v19, %v508_v37  ;;  %v2004_v51 = vpop.permute.xlu1 %688 }
  0xf9   :  { %v533_v18 = vadd.f32 %v531_v0, %v503_v34  ;;  %v539_v14 = vadd.f32 %v537_v8, %v509_v44  ;;  %v544_v61 = vsel %vm276_vm6, %v541_v54, %v543_v32  ;;  %v545_v7 = vsel %vm276_vm6, %v543_v32, %v541_v54 }
  0xfa   :  { %v574_v24 = vsel %vm307_vm7, %v571_v9, %v573_v13  ;;  %v575_v5 = vsel %vm307_vm7, %v573_v13, %v571_v9  ;;  %v2611_v39 = vstv %s2607_s3  ;;  %v2614_v4 = vstv %s2608_s15  ;;  %v2006_v60 = vpop.permute.xlu0 %686  ;;  %s2639_s3 = sld [smem:[#allocation80_spill]] }
  0xfb   :  { %v548_v25 = vmul.f32 %v2611_v39, %v544_v61  ;;  %v2612_v26 = vmov %v2611_v39  ;;  %v554_v1 = vmul.f32 %v2614_v4, %v544_v61  ;;  %v2615_v53 = vmov %v2614_v4 }
  0xfc   :  { %v549_v41 = vmul.f32 %v2612_v26, %v545_v7  ;;  %v555_v55 = vmul.f32 %v2615_v53, %v545_v7  ;;  %v2617_v33 = vstv %s2609_s1  ;;  %v2619_v40 = vstv %s2610_s5 }
  0xfd   :  { %v560_v32 = vmul.f32 %v2617_v33, %v544_v61  ;;  %v2618_v54 = vmov %v2617_v33  ;;  %v566_v10 = vmul.f32 %v2619_v40, %v544_v61  ;;  %v2620_v29 = vmov %v2619_v40 }
  0xfe   :  { %v561_v42 = vmul.f32 %v2618_v54, %v545_v7  ;;  %v567_v13 = vmul.f32 %v2620_v29, %v545_v7  ;;  %v550_v9 = vadd.f32 %v548_v25, %v520_v11  ;;  %v551_v43 = vadd.f32 %v549_v41, %v521_v17 }
  0xff   :  { %v556_v46 = vadd.f32 %v554_v1, %v526_v15  ;;  %v557_v36 = vadd.f32 %v555_v55, %v527_v16  ;;  %v562_v34 = vadd.f32 %v560_v32, %v532_v21  ;;  %v568_v44 = vadd.f32 %v566_v10, %v538_v22 }
 0x100   :  { %v563_v37 = vadd.f32 %v561_v42, %v533_v18  ;;  %v569_v45 = vadd.f32 %v567_v13, %v539_v14  ;;  %v2623_v52 = vstv %s2613_s23  ;;  %v2625_v48 = vstv %s2616_s30 }
 0x101   :  { %v578_v62 = vmul.f32 %v2623_v52, %v574_v24  ;;  %v2624_v6 = vmov %v2623_v52  ;;  %v584_v58 = vmul.f32 %v2625_v48, %v574_v24  ;;  %v2626_v57 = vmov %v2625_v48 }
 0x102   :  { %v579_v38 = vmul.f32 %v2624_v6, %v575_v5  ;;  %v585_v56 = vmul.f32 %v2626_v57, %v575_v5  ;;  %v2627_v0 = vstv %s2621_s2  ;;  %v2629_v8 = vstv %s2622_s16 }
 0x103   :  { %v590_v20 = vmul.f32 %v2627_v0, %v574_v24  ;;  %v2628_v19 = vmov %v2627_v0  ;;  %v596_v11 = vmul.f32 %v2629_v8, %v574_v24  ;;  %v2630_v17 = vmov %v2629_v8 }
 0x104   :  { %v591_v23 = vmul.f32 %v2628_v19, %v575_v5  ;;  %v597_v15 = vmul.f32 %v2630_v17, %v575_v5  ;;  %v580_v16 = vadd.f32 %v578_v62, %v550_v9  ;;  %v581_v21 = vadd.f32 %v579_v38, %v551_v43 }
 0x105   :  { %v586_v18 = vadd.f32 %v584_v58, %v556_v46  ;;  %v587_v22 = vadd.f32 %v585_v56, %v557_v36  ;;  %v592_v14 = vadd.f32 %v590_v20, %v562_v34  ;;  %v598_v7 = vadd.f32 %v596_v11, %v568_v44 }
 0x106   :  { %v593_v61 = vadd.f32 %v591_v23, %v563_v37  ;;  %v599_v39 = vadd.f32 %v597_v15, %v569_v45  ;;  %v606_v25 = vadd.f32 %v1603_v31, %v580_v16  ;;  %v607_v26 = vadd.f32 %v1606_v30, %v581_v21 }
 0x107   :  { %v612_v24 = vadd.f32 %v1609_v3, %v586_v18  ;;  %v613_v5 = vadd.f32 %v1612_v27, %v587_v22  ;;  %v618_v41 = vadd.f32 %v1619_v28, %v592_v14  ;;  %v624_v1 = vadd.f32 %v1625_v2, %v598_v7  ;;  %v717_v2 = vpop.permute.xlu0 %716 }
 0x108   :  { %v619_v4 = vadd.f32 %v1622_v59, %v593_v61  ;;  %v625_v31 = vadd.f32 %v1628_v63, %v599_v39  ;;  %v630_v30 = vsel %vm90_vm1, %v1954_v47, %v1952_v35  ;;  %v631_v27 = vsel %vm90_vm1, %v1952_v35, %v1954_v47  ;;  %v719_v59 = vpop.permute.xlu1 %718 }
 0x109   :  { %v660_v28 = vsel %vm121_vm0, %v657_v50, %v659_v49  ;;  %v661_v3 = vsel %vm121_vm0, %v659_v49, %v657_v50  ;;  %v2631_v53 = vstv %s1476_s17  ;;  %v2633_v32 = vstv %s1478_s18  ;;  %s2652_s18 = sld [smem:[#allocation85_spill]] }
 0x10a   :  { %v634_v63 = vmul.f32 %v2631_v53, %v630_v30  ;;  %v2632_v55 = vmov %v2631_v53  ;;  %v640_v54 = vmul.f32 %v2633_v32, %v630_v30  ;;  %v2634_v42 = vmov %v2633_v32 }
 0x10b   :  { %v635_v33 = vmul.f32 %v2632_v55, %v631_v27  ;;  %v641_v40 = vmul.f32 %v2634_v42, %v631_v27  ;;  %v2635_v35 = vstv %s1484_s29  ;;  %v2637_v49 = vstv %s1486_s0  ;;  %v747_v18 = vpop.permute.xlu0 %746  ;;  %s2657_s0 = sld [smem:[#allocation87_spill]] }
 0x10c   :  { %v646_v47 = vmul.f32 %v2635_v35, %v630_v30  ;;  %v2636_v10 = vmov %v2635_v35  ;;  %v652_v50 = vmul.f32 %v2637_v49, %v630_v30  ;;  %v2638_v13 = vmov %v2637_v49  ;;  %v749_v21 = vpop.permute.xlu1 %748 }
 0x10d   :  { %v647_v29 = vmul.f32 %v2636_v10, %v631_v27  ;;  %v653_v9 = vmul.f32 %v2638_v13, %v631_v27  ;;  %v636_v43 = vadd.f32 %v634_v63, %v606_v25  ;;  %v637_v46 = vadd.f32 %v635_v33, %v607_v26 }
 0x10e   :  { %v642_v36 = vadd.f32 %v640_v54, %v612_v24  ;;  %v643_v34 = vadd.f32 %v641_v40, %v613_v5  ;;  %v648_v37 = vadd.f32 %v646_v47, %v618_v41  ;;  %v654_v45 = vadd.f32 %v652_v50, %v624_v1 }
 0x10f   :  { %v649_v44 = vadd.f32 %v647_v29, %v619_v4  ;;  %v655_v52 = vadd.f32 %v653_v9, %v625_v31  ;;  %v2640_v62 = vstv %s1492_s14  ;;  %v2642_v58 = vstv %s2461_s6  ;;  %v777_v49 = vpop.permute.xlu0 %776 }
 0x110   :  { %v664_v6 = vmul.f32 %v2640_v62, %v660_v28  ;;  %v2641_v38 = vmov %v2640_v62  ;;  %v670_v57 = vmul.f32 %v2642_v58, %v660_v28  ;;  %v2643_v56 = vmov %v2642_v58  ;;  %v779_v29 = vpop.permute.xlu1 %778 }
 0x111   :  { %v665_v48 = vmul.f32 %v2641_v38, %v661_v3  ;;  %v671_v0 = vmul.f32 %v2643_v56, %v661_v3  ;;  %v2644_v20 = vstv %s2462_s28  ;;  %v2646_v11 = vstv %s2639_s3 }
 0x112   :  { %v676_v19 = vmul.f32 %v2644_v20, %v660_v28  ;;  %v2645_v23 = vmov %v2644_v20  ;;  %v682_v17 = vmul.f32 %v2646_v11, %v660_v28  ;;  %v2647_v15 = vmov %v2646_v11 }
 0x113   :  { %v677_v8 = vmul.f32 %v2645_v23, %v661_v3  ;;  %v683_v16 = vmul.f32 %v2647_v15, %v661_v3  ;;  %v666_v22 = vadd.f32 %v664_v6, %v636_v43  ;;  %v667_v14 = vadd.f32 %v665_v48, %v637_v46 }
 0x114   :  { %v672_v61 = vadd.f32 %v670_v57, %v642_v36  ;;  %v673_v7 = vadd.f32 %v671_v0, %v643_v34  ;;  %v678_v39 = vadd.f32 %v676_v19, %v648_v37  ;;  %v684_v26 = vadd.f32 %v682_v17, %v654_v45 }
 0x115   :  { %v679_v25 = vadd.f32 %v677_v8, %v649_v44  ;;  %v685_v24 = vadd.f32 %v683_v16, %v655_v52  ;;  %v690_v5 = vsel %vm152_vm2, %v2006_v60, %v2004_v51  ;;  %v691_v41 = vsel %vm152_vm2, %v2004_v51, %v2006_v60 }
 0x116   :  { %v720_v4 = vsel %vm183_vm3, %v717_v2, %v719_v59  ;;  %v721_v1 = vsel %vm183_vm3, %v719_v59, %v717_v2  ;;  %v2648_v31 = vstv %s2464_s20  ;;  %v2650_v3 = vstv %s2466_s13  ;;  %s2666_s13 = sld [smem:[#allocation88_spill]] }
 0x117   :  { %v694_v30 = vmul.f32 %v2648_v31, %v690_v5  ;;  %v2649_v27 = vmov %v2648_v31  ;;  %v700_v53 = vmul.f32 %v2650_v3, %v690_v5  ;;  %v2651_v63 = vmov %v2650_v3 }
 0x118   :  { %v695_v28 = vmul.f32 %v2649_v27, %v691_v41  ;;  %v701_v55 = vmul.f32 %v2651_v63, %v691_v41  ;;  %v2653_v33 = vstv %s2467_s10  ;;  %v2655_v60 = vstv %s2468_s26  ;;  %s2667_s26 = sld [smem:[#allocation89_spill]]  ;;  %s2674_s10 = sld [smem:[#allocation90_spill]] }
 0x119   :  { %v706_v32 = vmul.f32 %v2653_v33, %v690_v5  ;;  %v2654_v54 = vmov %v2653_v33  ;;  %v712_v42 = vmul.f32 %v2655_v60, %v690_v5  ;;  %v2656_v40 = vmov %v2655_v60 }
 0x11a   :  { %v707_v51 = vmul.f32 %v2654_v54, %v691_v41  ;;  %v713_v59 = vmul.f32 %v2656_v40, %v691_v41  ;;  %v696_v2 = vadd.f32 %v694_v30, %v666_v22  ;;  %v697_v35 = vadd.f32 %v695_v28, %v667_v14 }
 0x11b   :  { %v702_v47 = vadd.f32 %v700_v53, %v672_v61  ;;  %v703_v10 = vadd.f32 %v701_v55, %v673_v7  ;;  %v708_v50 = vadd.f32 %v706_v32, %v678_v39  ;;  %v714_v9 = vadd.f32 %v712_v42, %v684_v26  ;;  %v807_v26 = vpop.permute.xlu0 %806 }
 0x11c   :  { %v709_v13 = vadd.f32 %v707_v51, %v679_v25  ;;  %v715_v43 = vadd.f32 %v713_v59, %v685_v24  ;;  %v2658_v46 = vstv %s2652_s18  ;;  %v2660_v44 = vstv %s2471_s21  ;;  %v809_v25 = vpop.permute.xlu1 %808  ;;  %s2677_s21 = sld [smem:[#allocation91_spill]] }
 0x11d   :  { %v724_v36 = vmul.f32 %v2658_v46, %v720_v4  ;;  %v2659_v34 = vmov %v2658_v46  ;;  %v730_v45 = vmul.f32 %v2660_v44, %v720_v4  ;;  %v2661_v52 = vmov %v2660_v44 }
 0x11e   :  { %v725_v37 = vmul.f32 %v2659_v34, %v721_v1  ;;  %v731_v62 = vmul.f32 %v2661_v52, %v721_v1  ;;  %v2662_v6 = vstv %s1548_s24  ;;  %v2664_v57 = vstv %s2657_s0 }
 0x11f   :  { %v736_v38 = vmul.f32 %v2662_v6, %v720_v4  ;;  %v2663_v48 = vmov %v2662_v6  ;;  %v742_v56 = vmul.f32 %v2664_v57, %v720_v4  ;;  %v2665_v0 = vmov %v2664_v57  ;;  %v837_v6 = vpop.permute.xlu0 %836 }
 0x120   :  { %v737_v58 = vmul.f32 %v2663_v48, %v721_v1  ;;  %v743_v20 = vmul.f32 %v2665_v0, %v721_v1  ;;  %v726_v19 = vadd.f32 %v724_v36, %v696_v2  ;;  %v727_v23 = vadd.f32 %v725_v37, %v697_v35 }
 0x121   :  { %v732_v8 = vadd.f32 %v730_v45, %v702_v47  ;;  %v733_v11 = vadd.f32 %v731_v62, %v703_v10  ;;  %v738_v17 = vadd.f32 %v736_v38, %v708_v50  ;;  %v744_v16 = vadd.f32 %v742_v56, %v714_v9  ;;  %v839_v62 = vpop.permute.xlu1 %838 }
 0x122   :  { %v739_v15 = vadd.f32 %v737_v58, %v709_v13  ;;  %v745_v22 = vadd.f32 %v743_v20, %v715_v43  ;;  %v750_v14 = vsel %vm214_vm4, %v747_v18, %v749_v21  ;;  %v751_v61 = vsel %vm214_vm4, %v749_v21, %v747_v18 }
 0x123   :  { %v780_v7 = vsel %vm245_vm5, %v777_v49, %v779_v29  ;;  %v781_v39 = vsel %vm245_vm5, %v779_v29, %v777_v49  ;;  %v2668_v24 = vstv %s1556_s8  ;;  %v2670_v1 = vstv %s2666_s13  ;;  %s2695_s8 = sld [smem:[#allocation79_spill]] }
 0x124   :  { %v754_v5 = vmul.f32 %v2668_v24, %v750_v14  ;;  %v2669_v41 = vmov %v2668_v24  ;;  %v760_v31 = vmul.f32 %v2670_v1, %v750_v14  ;;  %v2671_v30 = vmov %v2670_v1 }
 0x125   :  { %v755_v4 = vmul.f32 %v2669_v41, %v751_v61  ;;  %v761_v27 = vmul.f32 %v2671_v30, %v751_v61  ;;  %v2672_v21 = vstv %s1564_s12  ;;  %v2675_v53 = vstv %s2667_s26  ;;  %s2686_s12 = sld [smem:[#allocation92_spill]] }
 0x126   :  { %v766_v18 = vmul.f32 %v2672_v21, %v750_v14  ;;  %v2673_v28 = vmov %v2672_v21  ;;  %v772_v63 = vmul.f32 %v2675_v53, %v750_v14  ;;  %v2676_v55 = vmov %v2675_v53 }
 0x127   :  { %v767_v3 = vmul.f32 %v2673_v28, %v751_v61  ;;  %v773_v33 = vmul.f32 %v2676_v55, %v751_v61  ;;  %v756_v32 = vadd.f32 %v754_v5, %v726_v19  ;;  %v757_v54 = vadd.f32 %v755_v4, %v727_v23 }
 0x128   :  { %v762_v51 = vadd.f32 %v760_v31, %v732_v8  ;;  %v763_v60 = vadd.f32 %v761_v27, %v733_v11  ;;  %v768_v42 = vadd.f32 %v766_v18, %v738_v17  ;;  %v774_v59 = vadd.f32 %v772_v63, %v744_v16 }
 0x129   :  { %v769_v40 = vadd.f32 %v767_v3, %v739_v15  ;;  %v775_v2 = vadd.f32 %v773_v33, %v745_v22  ;;  %v2678_v35 = vstv %s1572_s22  ;;  %v2680_v49 = vstv %s1574_s11 }
 0x12a   :  { %v784_v47 = vmul.f32 %v2678_v35, %v780_v7  ;;  %v2679_v10 = vmov %v2678_v35  ;;  %v790_v50 = vmul.f32 %v2680_v49, %v780_v7  ;;  %v2681_v13 = vmov %v2680_v49 }
 0x12b   :  { %v785_v29 = vmul.f32 %v2679_v10, %v781_v39  ;;  %v791_v9 = vmul.f32 %v2681_v13, %v781_v39  ;;  %v2682_v43 = vstv %s2674_s10  ;;  %v2684_v37 = vstv %s2677_s21 }
 0x12c   :  { %v796_v46 = vmul.f32 %v2682_v43, %v780_v7  ;;  %v2683_v36 = vmov %v2682_v43  ;;  %v802_v44 = vmul.f32 %v2684_v37, %v780_v7  ;;  %v2685_v45 = vmov %v2684_v37 }
 0x12d   :  { %v797_v34 = vmul.f32 %v2683_v36, %v781_v39  ;;  %v803_v52 = vmul.f32 %v2685_v45, %v781_v39  ;;  %v786_v38 = vadd.f32 %v784_v47, %v756_v32  ;;  %v787_v48 = vadd.f32 %v785_v29, %v757_v54 }
 0x12e   :  { %v792_v58 = vadd.f32 %v790_v50, %v762_v51  ;;  %v793_v57 = vadd.f32 %v791_v9, %v763_v60  ;;  %v798_v56 = vadd.f32 %v796_v46, %v768_v42  ;;  %v804_v20 = vadd.f32 %v802_v44, %v774_v59 }
 0x12f   :  { %v799_v0 = vadd.f32 %v797_v34, %v769_v40  ;;  %v805_v19 = vadd.f32 %v803_v52, %v775_v2  ;;  %v810_v23 = vsel %vm276_vm6, %v807_v26, %v809_v25  ;;  %v811_v8 = vsel %vm276_vm6, %v809_v25, %v807_v26 }
 0x130   :  { %v840_v11 = vsel %vm307_vm7, %v837_v6, %v839_v62  ;;  %v841_v17 = vsel %vm307_vm7, %v839_v62, %v837_v6  ;;  %v2687_v15 = vstv %s1588_s27  ;;  %v2689_v61 = vstv %s1590_s9  ;;  %s1098_s27 = smov [#allocation9]  }
 0x131   :  { %v814_v16 = vmul.f32 %v2687_v15, %v810_v23  ;;  %v2688_v22 = vmov %v2687_v15  ;;  %v820_v7 = vmul.f32 %v2689_v61, %v810_v23  ;;  %v2690_v39 = vmov %v2689_v61  ;;  %s880_s11 = sshll.u32 %s1098_s27, 4  ;;  %s881_s11 = int_to_ptr.vmem [resolvable:$true] %s880_s11 }
 0x132   :  { %v815_v14 = vmul.f32 %v2688_v22, %v811_v8  ;;  %v821_v24 = vmul.f32 %v2690_v39, %v811_v8  ;;  %v2691_v5 = vstv %s1598_s25  ;;  %v2693_v4 = vstv %s2686_s12  ;;  %p1062_p3 = scmp.lt.s32.totalorder %s881_s11, %s881_s11 }
 0x133   :  { %v826_v25 = vmul.f32 %v2691_v5, %v810_v23  ;;  %v2692_v26 = vmov %v2691_v5  ;;  %v832_v1 = vmul.f32 %v2693_v4, %v810_v23  ;;  %v2694_v12 = vmov %v2693_v4 }
 0x134   :  { %v827_v41 = vmul.f32 %v2692_v26, %v811_v8  ;;  %v833_v31 = vmul.f32 %v2694_v12, %v811_v8  ;;  %v816_v30 = vadd.f32 %v814_v16, %v786_v38  ;;  %v817_v27 = vadd.f32 %v815_v14, %v787_v48 }
 0x135   :  { %v822_v21 = vadd.f32 %v820_v7, %v792_v58  ;;  %v823_v18 = vadd.f32 %v821_v24, %v793_v57  ;;  %v828_v28 = vadd.f32 %v826_v25, %v798_v56  ;;  %v834_v53 = vadd.f32 %v832_v1, %v804_v20 }
 0x136   :  { %v829_v3 = vadd.f32 %v827_v41, %v799_v0  ;;  %v835_v63 = vadd.f32 %v833_v31, %v805_v19  ;;  %v2696_v55 = vstv %s1614_s7  ;;  %v2698_v51 = vstv %s2472_s19  ;;  %s1057_s7 = scalar_lea.vmem %s881_s11, 1024 }
 0x137   :  { %v844_v33 = vmul.f32 %v2696_v55, %v840_v11  ;;  %v2697_v32 = vmov %v2696_v55  ;;  %v850_v60 = vmul.f32 %v2698_v51, %v840_v11  ;;  %v2699_v42 = vmov %v2698_v51  ;;  %p1058_p2 = scmp.ne.s32.totalorder %s881_s11, %s1057_s7  ;;  %p1063_p4 = scmp.lt.s32.totalorder %s1057_s7, %s1057_s7 }
 0x138   :  { %v845_v54 = vmul.f32 %v2697_v32, %v841_v17  ;;  %v851_v40 = vmul.f32 %v2699_v42, %v841_v17  ;;  %v2700_v59 = vstv %s2695_s8  ;;  %v2702_v10 = vstv %s1632_s4 }
 0x139   :  { %v856_v2 = vmul.f32 %v2700_v59, %v840_v11  ;;  %v2701_v35 = vmov %v2700_v59  ;;  %v862_v29 = vmul.f32 %v2702_v10, %v840_v11  ;;  %v2703_v49 = vmov %v2702_v10  ;;  %p1064_p5 = por %p1063_p4, %p1062_p3 }
 0x13a   :  { %v857_v47 = vmul.f32 %v2701_v35, %v841_v17  ;;  %v863_v50 = vmul.f32 %v2703_v49, %v841_v17  ;;  %v846_v13 = vadd.f32 %v844_v33, %v816_v30  ;;  %v847_v9 = vadd.f32 %v845_v54, %v817_v27 }
 0x13b   :  { %v852_v43 = vadd.f32 %v850_v60, %v822_v21  ;;  %v853_v46 = vadd.f32 %v851_v40, %v823_v18  ;;  %v858_v36 = vadd.f32 %v856_v2, %v828_v28  ;;  %v864_v37 = vadd.f32 %v862_v29, %v834_v53  ;;  %p1065_p6 = pnand %p1064_p5, %p1058_p2 }
 0x13c   :  { %v859_v34 = vadd.f32 %v857_v47, %v829_v3  ;;  %v865_v44 = vadd.f32 %v863_v50, %v835_v63  ;;  %866 = vst [vmem:[#allocation9] sm:$0xff] %v846_v13  ;;  %867 = vst [vmem:[#allocation9 + $0x8] sm:$0xff] %v847_v9 }
 0x13d   :  { %868 = vst [vmem:[#allocation9 + $0x10] sm:$0xff] %v852_v43  ;;  %869 = vst [vmem:[#allocation9 + $0x18] sm:$0xff] %v853_v46 }
 0x13e   :  { %870 = vst [vmem:[#allocation9 + $0x20] sm:$0xff] %v858_v36  ;;  %871 = vst [vmem:[#allocation9 + $0x28] sm:$0xff] %v859_v34 }
 0x13f   :  { %872 = vst [vmem:[#allocation9 + $0x30] sm:$0xff] %v864_v37  ;;  %873 = vst [vmem:[#allocation9 + $0x38] sm:$0xff] %v865_v44 }
 0x140   :  { %1068 = shalt.err (!%p1065_p6)
}
 0x141   :  { %s2704_s29 = sld [smem:[#allocation93_spill]] }
 0x147   :  { %s1069_s17 = scalar_lea.hbm %s2704_s29, 1024 }
 0x148   :  { %p1070_p7 = scmp.ne.s32.totalorder %s2704_s29, %s1069_s17  ;;  %p1073_p8 = scmp.lt.u32.totalorder %s1069_s17, %s2704_s29 }
 0x14a   :  { %p1075_p9 = pnand %p1073_p8, %p1070_p7 }
 0x14c   :  { %1078 = shalt.err (!%p1075_p9)
}
 0x14d   :  { %883 = dma.vmem_to_hbm [thread:$0]  %s881_s11, 1024, %s2704_s29, [#allocation4]  }
 0x14e   :  { %1085 = dma.done.wait [#allocation4], 1024  }
 0x14f   :  { %1086 = vsyncadd [#allocation4], 4294966272 }
 0x150   :  { %887 = vsyncpa [#allocation3], 1 }
 0x151   :  { %888 = vsyncpa [#allocation4], 1 }
 0x152   :  { %889 = vsyncpa [#allocation5], 1 }
 0x153   :  { %890 = vsyncpa [#allocation6], 1 }

</bundles_post_ra>
